<compile_context>
chip_gen: v6e
topology: v6e:2x2x1
jax: 0.10.0
libtpu: 0.0.40
codegen_flags: <defaults>
</compile_context>

<pallas_src>
import functools

import jax
import jax.numpy as jnp
from jax.experimental import pallas as pl
from jax.experimental.pallas import tpu as pltpu


# ----------------------------- kernels ----------------------------------- #

def point_feat_kernel(x_ref, w1_ref, b1_ref, w2_ref, b2_ref, w3_ref, b3_ref,
                      out_ref, *scratch, n_points, tn):
    """One (batch, point-tile) step of the per-point MLP + max-pool.

    Transposed orientation (channels on sublanes, points on lanes) so the
    (B, C, N) input needs no transpose anywhere.
    """
    x = x_ref[0]                              # (C, TN) f32, lane-dense points
    C = x.shape[0]

    # ---- conv1 on the VPU: contraction length C (3/4) is too small for the
    # MXU, so do C broadcast multiply-adds (static unrolled loop).
    h = b1_ref[...]                           # (64, 1)
    for c in range(C):
        h = h + w1_ref[:, c:c + 1] * x[c:c + 1, :]
    h = jnp.maximum(h, 0.0)                   # (64, TN) f32

    # ---- conv2 on the MXU: bf16 inputs, f32 accumulation.
    h = jnp.dot(w2_ref[...], h.astype(jnp.bfloat16),
                preferred_element_type=jnp.float32) + b2_ref[...]
    h = jnp.maximum(h, 0.0)                   # (128, TN) f32

    # ---- conv3 raw scores: bias + ReLU deferred past the point reduction
    # (both are monotone, so max_n(relu(s + b)) == relu(max_n(s) + b)).
    s = jnp.dot(w3_ref[...], h.astype(jnp.bfloat16),
                preferred_element_type=jnp.float32)       # (1024, TN) f32

    if not scratch:
        # Single point tile (N <= TN): reduce directly, then bias + ReLU.
        m = jnp.max(s, axis=1, keepdims=True)             # (1024, 1)
        out_ref[0] = jnp.maximum(m + b3_ref[...], 0.0)
        return

    acc_ref, = scratch                        # (1024, 128) f32 partial max
    k = pl.program_id(1)
    last = pl.num_programs(1) - 1

    @pl.when(k == 0)
    def _init():
        acc_ref[...] = jnp.full_like(acc_ref, -jnp.inf)

    n_slices = tn // 128                      # multi-tile path: tn % 128 == 0
    ragged = (n_points % tn) != 0

    def accumulate(mask_tail):
        # Lane-dense VPU maxima over 128-wide slices; co-issues with MXU work.
        lane = jax.lax.broadcasted_iota(jnp.int32, (1, 128), 1)
        part = None
        for j in range(n_slices):
            sl = s[:, j * 128:(j + 1) * 128]              # (1024, 128)
            if mask_tail:
                # Padded edge-block lanes hold garbage; mask raw scores to
                # -inf BEFORE the max (post-ReLU 0-masking no longer valid).
                valid = (k * tn + j * 128 + lane) < n_points
                sl = jnp.where(valid, sl, -jnp.inf)
            part = sl if part is None else jnp.maximum(part, sl)
        acc_ref[...] = jnp.maximum(acc_ref[...], part)

    if ragged:
        # The iota/compare/select tail mask only runs on the final tile.
        @pl.when(k < last)
        def _acc_body():
            accumulate(False)

        @pl.when(k == last)
        def _acc_tail():
            accumulate(True)
    else:
        accumulate(False)

    @pl.when(k == last)
    def _finalize():
        # Single cross-lane (XLU) reduce + bias + ReLU + (1024,1) store,
        # once per batch instead of once per point tile.
        m = jnp.max(acc_ref[...], axis=1, keepdims=True)  # (1024, 1)
        out_ref[0] = jnp.maximum(m + b3_ref[...], 0.0)


def head_kernel(g_ref, w4_ref, b4_ref, w5_ref, b5_ref, w6_ref, b6_ref,
                out_ref):
    """Batch-tile of relu(bn(fc1)) -> relu(bn(fc2)) -> fc3 (+identity in bias)."""
    g = g_ref[...].astype(jnp.bfloat16)                     # (TB, 1024)
    h = jnp.dot(g, w4_ref[...],
                preferred_element_type=jnp.float32) + b4_ref[...]
    h = jnp.maximum(h, 0.0)                                  # (TB, 512)
    h = jnp.dot(h.astype(jnp.bfloat16), w5_ref[...],
                preferred_element_type=jnp.float32) + b5_ref[...]
    h = jnp.maximum(h, 0.0)                                  # (TB, 256)
    out_ref[...] = jnp.dot(h.astype(jnp.bfloat16), w6_ref[...],
                           preferred_element_type=jnp.float32) + b6_ref[...]


# ----------------------------- wrapper ----------------------------------- #

def _fold_bn(w, b, gamma, beta, mean, var, eps=1e-5):
    """BN(x @ w + b) == x @ (w*s) + (s*(b - mean) + beta), s = gamma/sqrt(var+eps)."""
    s = gamma / jnp.sqrt(var + eps)
    return w * s[None, :], s * (b - mean) + beta


def _pick_point_tile(n_points):
    """Generation-aware point-tile size and scoped-VMEM budget."""
    cap = 2048                                   # safe on v7x (64 MiB / TC)
    try:
        info = pltpu.get_tpu_info()
        if getattr(info, "vmem_capacity_bytes", 0) >= 128 * 1024 * 1024:
            cap = 4096                           # v5e / v6e: 128 MiB VMEM
    except Exception:
        pass
    tn = n_points if n_points <= cap else cap
    if tn >= 4096:
        vmem = 64 * 1024 * 1024                  # only reached on 128 MiB chips
    elif tn >= 2048:
        vmem = 48 * 1024 * 1024                  # within v7x's 64 MiB physical
    else:
        vmem = 32 * 1024 * 1024
    return tn, vmem


def stn3d_forward(x_bcn, params):
    B, C, N = x_bcn.shape
    x = x_bcn.astype(jnp.float32)                      # keep (B, C, N) layout

    w1, b1 = _fold_bn(params["w1"], params["b1"], *params["bn1"])
    w2, b2 = _fold_bn(params["w2"], params["b2"], *params["bn2"])
    w3, b3 = _fold_bn(params["w3"], params["b3"], *params["bn3"])
    w4, b4 = _fold_bn(params["w4"], params["b4"], *params["bn4"])
    w5, b5 = _fold_bn(params["w5"], params["b5"], *params["bn5"])
    w6, b6 = params["w6"], params["b6"]

    # Transposed (out, in) weights for the point kernel; layer 1 stays f32
    # (VPU), layers 2/3 go bf16 (MXU inputs).
    w1t = jnp.transpose(w1)                            # (64, C)   f32
    w2t = jnp.transpose(w2).astype(jnp.bfloat16)       # (128, 64)
    w3t = jnp.transpose(w3).astype(jnp.bfloat16)       # (1024, 128)

    TN, vmem_bytes = _pick_point_tile(N)
    n_ktiles = pl.cdiv(N, TN)

    # Partial-max scratch only needed when the point dim is tiled.
    scratch_shapes = []
    if n_ktiles > 1:
        scratch_shapes = [pltpu.VMEM((1024, 128), jnp.float32)]

    feat = pl.pallas_call(
        functools.partial(point_feat_kernel, n_points=N, tn=TN),
        out_shape=jax.ShapeDtypeStruct((B, 1024, 1), jnp.float32),
        grid_spec=pltpu.PrefetchScalarGridSpec(
            num_scalar_prefetch=0,
            grid=(B, n_ktiles),
            in_specs=[
                pl.BlockSpec((1, C, TN), lambda b, k: (b, 0, k)),
                pl.BlockSpec((64, C), lambda b, k: (0, 0)),
                pl.BlockSpec((64, 1), lambda b, k: (0, 0)),
                pl.BlockSpec((128, 64), lambda b, k: (0, 0)),
                pl.BlockSpec((128, 1), lambda b, k: (0, 0)),
                pl.BlockSpec((1024, 128), lambda b, k: (0, 0)),
                pl.BlockSpec((1024, 1), lambda b, k: (0, 0)),
            ],
            out_specs=pl.BlockSpec((1, 1024, 1), lambda b, k: (b, 0, 0)),
            scratch_shapes=scratch_shapes,
        ),
        compiler_params=pltpu.CompilerParams(
            dimension_semantics=("parallel", "arbitrary"),
            vmem_limit_bytes=vmem_bytes),
    )(x, w1t, b1.reshape(64, 1), w2t, b2.reshape(128, 1),
      w3t, b3.reshape(1024, 1))

    feat = feat.reshape(B, 1024)                       # (B,1024,1) -> (B,1024)

    # ---- FC head: pad fc3 output to 128 lanes (lane-dense stores) and fold
    # the 3x3 identity into the bias.
    iden = jnp.array([1., 0., 0., 0., 1., 0., 0., 0., 1.], jnp.float32)
    w6p = jnp.zeros((256, 128), jnp.float32).at[:, :9].set(w6)
    b6p = jnp.zeros((128,), jnp.float32).at[:9].set(b6 + iden)

    TB = B if B <= 256 else 256
    out_pad = pl.pallas_call(
        head_kernel,
        out_shape=jax.ShapeDtypeStruct((B, 128), jnp.float32),
        grid_spec=pltpu.PrefetchScalarGridSpec(
            num_scalar_prefetch=0,
            grid=(pl.cdiv(B, TB),),
            in_specs=[
                pl.BlockSpec((TB, 1024), lambda i: (i, 0)),
                pl.BlockSpec((1024, 512), lambda i: (0, 0)),
                pl.BlockSpec((1, 512), lambda i: (0, 0)),
                pl.BlockSpec((512, 256), lambda i: (0, 0)),
                pl.BlockSpec((1, 256), lambda i: (0, 0)),
                pl.BlockSpec((256, 128), lambda i: (0, 0)),
                pl.BlockSpec((1, 128), lambda i: (0, 0)),
            ],
            out_specs=pl.BlockSpec((TB, 128), lambda i: (i, 0)),
        ),
        compiler_params=pltpu.CompilerParams(
            dimension_semantics=("parallel",)),
    )(feat, w4.astype(jnp.bfloat16), b4.reshape(1, 512),
      w5.astype(jnp.bfloat16), b5.reshape(1, 256),
      w6p.astype(jnp.bfloat16), b6p.reshape(1, 128))

    return out_pad[:, :9].reshape(B, 3, 3)


# ------------------------ pure-JAX reference ----------------------------- #

def stn3d_reference(x_bcn, params):
    B, C, N = x_bcn.shape
    x = jnp.transpose(x_bcn, (0, 2, 1)).astype(jnp.float32)   # (B, N, C)
    w1, b1 = _fold_bn(params["w1"], params["b1"], *params["bn1"])
    w2, b2 = _fold_bn(params["w2"], params["b2"], *params["bn2"])
    w3, b3 = _fold_bn(params["w3"], params["b3"], *params["bn3"])
    w4, b4 = _fold_bn(params["w4"], params["b4"], *params["bn4"])
    w5, b5 = _fold_bn(params["w5"], params["b5"], *params["bn5"])
    h = jax.nn.relu(x @ w1 + b1)
    h = jax.nn.relu(h @ w2 + b2)
    h = jax.nn.relu(h @ w3 + b3)
    g = jnp.max(h, axis=1)                                    # (B, 1024)
    h = jax.nn.relu(g @ w4 + b4)
    h = jax.nn.relu(h @ w5 + b5)
    out = h @ params["w6"] + params["b6"]
    out = out + jnp.array([1., 0., 0., 0., 1., 0., 0., 0., 1.], jnp.float32)
    return out.reshape(B, 3, 3)


# ----------------------- deterministic parameters ------------------------ #

def init_params(key, channel):
    ks = jax.random.split(key, 16)

    def w(k, shape, scale=0.05):
        return (scale * jax.random.normal(k, shape)).astype(jnp.float32)

    def bn(k, n):
        kg, kb, km, kv = jax.random.split(k, 4)
        gamma = 1.0 + 0.1 * jax.random.normal(kg, (n,))
        beta = 0.1 * jax.random.normal(kb, (n,))
        mean = 0.1 * jax.random.normal(km, (n,))
        var = 1.0 + 0.1 * jax.random.uniform(kv, (n,))
        return (gamma.astype(jnp.float32), beta.astype(jnp.float32),
                mean.astype(jnp.float32), var.astype(jnp.float32))

    return {
        # weights stored pre-transposed: (in_features, out_features)
        "w1": w(ks[0], (channel, 64)), "b1": w(ks[1], (64,)),
        "w2": w(ks[2], (64, 128)),     "b2": w(ks[3], (128,)),
        "w3": w(ks[4], (128, 1024)),   "b3": w(ks[5], (1024,)),
        "w4": w(ks[6], (1024, 512)),   "b4": w(ks[7], (512,)),
        "w5": w(ks[8], (512, 256)),    "b5": w(ks[9], (256,)),
        "w6": w(ks[10], (256, 9)),     "b6": w(ks[11], (9,)),
        "bn1": bn(ks[12], 64),
        "bn2": bn(ks[13], 128),
        "bn3": bn(ks[14], 1024),
        "bn4": bn(ks[15], 512),
        "bn5": bn(jax.random.fold_in(key, 99), 256),
    }


if __name__ == "__main__":
    key = jax.random.PRNGKey(0)
    k_x, k_p, k_x2, k_p2 = jax.random.split(key, 4)

    # --- small shape (single point-tile path) -----------------------------
    B, C, N = 2, 4, 16                       # batch, channels, num points
    x = jax.random.normal(k_x, (B, C, N), dtype=jnp.float32)
    params = init_params(k_p, C)

    out = stn3d_forward(x, params)
    out = jax.block_until_ready(out)
    assert out.shape == (B, 3, 3) and out.dtype == jnp.float32

    ref = stn3d_reference(x, params)
    assert jnp.allclose(out, ref, atol=5e-2, rtol=5e-2)

    # --- larger N (multi-tile path: partial-max scratch + ragged tail) ----
    B2, C2, N2 = 2, 3, 4608                  # ragged for both TN=2048 / 4096
    x2 = jax.random.normal(k_x2, (B2, C2, N2), dtype=jnp.float32)
    params2 = init_params(k_p2, C2)

    out2 = stn3d_forward(x2, params2)
    out2 = jax.block_until_ready(out2)
    assert out2.shape == (B2, 3, 3) and out2.dtype == jnp.float32

    ref2 = stn3d_reference(x2, params2)
    # bf16 MXU inputs vs pure-f32 reference -> modest tolerance.
    assert jnp.allclose(out2, ref2, atol=1e-1, rtol=5e-2)

    print("KERNEL_OK")
</pallas_src>

<mosaic_0001>
module attributes {stable_mosaic.version = 11 : i64} {
  func.func @point_feat_kernel(%arg0: i32, %arg1: i32, %arg2: memref<1x4x16xf32, #tpu.memory_space<vmem>>, %arg3: memref<64x4xf32, #tpu.memory_space<vmem>>, %arg4: memref<64x1xf32, #tpu.memory_space<vmem>>, %arg5: memref<128x64xbf16, #tpu.memory_space<vmem>>, %arg6: memref<128x1xf32, #tpu.memory_space<vmem>>, %arg7: memref<1024x128xbf16, #tpu.memory_space<vmem>>, %arg8: memref<1024x1xf32, #tpu.memory_space<vmem>>, %arg9: memref<1x1024x1xf32, #tpu.memory_space<vmem>>) attributes {dimension_semantics = [#tpu.dimension_semantics<parallel>, #tpu.dimension_semantics<arbitrary>], iteration_bounds = array<i64: 2, 1>, scalar_prefetch = 0 : i64, scratch_operands = 0 : i64, tpu.core_type = #tpu.core_type<tc>, window_params = [{transform_indices = @transform_0, window_bounds = array<i64: 1, 4, 16>}, {pipeline_mode = #tpu.pipeline_mode<synchronous>, transform_indices = @transform_1, window_bounds = array<i64: 64, 4>}, {pipeline_mode = #tpu.pipeline_mode<synchronous>, transform_indices = @transform_2, window_bounds = array<i64: 64, 1>}, {pipeline_mode = #tpu.pipeline_mode<synchronous>, transform_indices = @transform_3, window_bounds = array<i64: 128, 64>}, {pipeline_mode = #tpu.pipeline_mode<synchronous>, transform_indices = @transform_4, window_bounds = array<i64: 128, 1>}, {pipeline_mode = #tpu.pipeline_mode<synchronous>, transform_indices = @transform_5, window_bounds = array<i64: 1024, 128>}, {pipeline_mode = #tpu.pipeline_mode<synchronous>, transform_indices = @transform_6, window_bounds = array<i64: 1024, 1>}, {transform_indices = @transform_7, window_bounds = array<i64: 1, 1024, 1>}]} {
    %c0 = arith.constant 0 : index
    %c0_0 = arith.constant 0 : index
    %c0_1 = arith.constant 0 : index
    %0 = vector.load %arg2[%c0, %c0_0, %c0_1] : memref<1x4x16xf32, #tpu.memory_space<vmem>>, vector<1x4x16xf32>
    %1 = vector.shape_cast %0 : vector<1x4x16xf32> to vector<4x16xf32>
    %c0_2 = arith.constant 0 : index
    %c0_3 = arith.constant 0 : index
    %2 = vector.load %arg4[%c0_2, %c0_3] : memref<64x1xf32, #tpu.memory_space<vmem>>, vector<64x1xf32>
    %c0_4 = arith.constant 0 : index
    %c0_5 = arith.constant 0 : index
    %3 = vector.load %arg3[%c0_4, %c0_5] : memref<64x4xf32, #tpu.memory_space<vmem>>, vector<64x1xf32>
    %4 = vector.extract_strided_slice %1 {offsets = [0, 0], sizes = [1, 16], strides = [1, 1]} : vector<4x16xf32> to vector<1x16xf32>
    %5 = vector.broadcast %3 : vector<64x1xf32> to vector<64x16xf32>
    %6 = vector.broadcast %4 : vector<1x16xf32> to vector<64x16xf32>
    %7 = arith.mulf %5, %6 : vector<64x16xf32>
    %8 = vector.broadcast %2 : vector<64x1xf32> to vector<64x16xf32>
    %9 = arith.addf %8, %7 : vector<64x16xf32>
    %c0_6 = arith.constant 0 : index
    %c1 = arith.constant 1 : index
    %10 = vector.load %arg3[%c0_6, %c1] : memref<64x4xf32, #tpu.memory_space<vmem>>, vector<64x1xf32>
    %11 = vector.extract_strided_slice %1 {offsets = [1, 0], sizes = [1, 16], strides = [1, 1]} : vector<4x16xf32> to vector<1x16xf32>
    %12 = vector.broadcast %10 : vector<64x1xf32> to vector<64x16xf32>
    %13 = vector.broadcast %11 : vector<1x16xf32> to vector<64x16xf32>
    %14 = arith.mulf %12, %13 : vector<64x16xf32>
    %15 = arith.addf %9, %14 : vector<64x16xf32>
    %c0_7 = arith.constant 0 : index
    %c2 = arith.constant 2 : index
    %16 = vector.load %arg3[%c0_7, %c2] : memref<64x4xf32, #tpu.memory_space<vmem>>, vector<64x1xf32>
    %17 = vector.extract_strided_slice %1 {offsets = [2, 0], sizes = [1, 16], strides = [1, 1]} : vector<4x16xf32> to vector<1x16xf32>
    %18 = vector.broadcast %16 : vector<64x1xf32> to vector<64x16xf32>
    %19 = vector.broadcast %17 : vector<1x16xf32> to vector<64x16xf32>
    %20 = arith.mulf %18, %19 : vector<64x16xf32>
    %21 = arith.addf %15, %20 : vector<64x16xf32>
    %c0_8 = arith.constant 0 : index
    %c3 = arith.constant 3 : index
    %22 = vector.load %arg3[%c0_8, %c3] : memref<64x4xf32, #tpu.memory_space<vmem>>, vector<64x1xf32>
    %23 = vector.extract_strided_slice %1 {offsets = [3, 0], sizes = [1, 16], strides = [1, 1]} : vector<4x16xf32> to vector<1x16xf32>
    %24 = vector.broadcast %22 : vector<64x1xf32> to vector<64x16xf32>
    %25 = vector.broadcast %23 : vector<1x16xf32> to vector<64x16xf32>
    %26 = arith.mulf %24, %25 : vector<64x16xf32>
    %27 = arith.addf %21, %26 : vector<64x16xf32>
    %cst = arith.constant 0.000000e+00 : f32
    %28 = vector.broadcast %cst : f32 to vector<64x16xf32>
    %29 = arith.maximumf %27, %28 : vector<64x16xf32>
    %c0_9 = arith.constant 0 : index
    %c0_10 = arith.constant 0 : index
    %30 = vector.load %arg5[%c0_9, %c0_10] : memref<128x64xbf16, #tpu.memory_space<vmem>>, vector<128x64xbf16>
    %31 = arith.truncf %29 : vector<64x16xf32> to vector<64x16xbf16>
    %cst_11 = arith.constant dense<0.000000e+00> : vector<128x16xf32>
    %32 = tpu.matmul %30, %31, %cst_11 {dimension_numbers = #tpu.dot_dimension_numbers<[1], [0], [0], [1], [0, 0, 1, 1], [], []>} : vector<128x64xbf16>, vector<64x16xbf16>, vector<128x16xf32> -> vector<128x16xf32>
    %c0_12 = arith.constant 0 : index
    %c0_13 = arith.constant 0 : index
    %33 = vector.load %arg6[%c0_12, %c0_13] : memref<128x1xf32, #tpu.memory_space<vmem>>, vector<128x1xf32>
    %34 = vector.broadcast %33 : vector<128x1xf32> to vector<128x16xf32>
    %35 = arith.addf %32, %34 : vector<128x16xf32>
    %cst_14 = arith.constant 0.000000e+00 : f32
    %36 = vector.broadcast %cst_14 : f32 to vector<128x16xf32>
    %37 = arith.maximumf %35, %36 : vector<128x16xf32>
    %c0_15 = arith.constant 0 : index
    %c0_16 = arith.constant 0 : index
    %38 = vector.load %arg7[%c0_15, %c0_16] : memref<1024x128xbf16, #tpu.memory_space<vmem>>, vector<1024x128xbf16>
    %39 = arith.truncf %37 : vector<128x16xf32> to vector<128x16xbf16>
    %cst_17 = arith.constant dense<0.000000e+00> : vector<1024x16xf32>
    %40 = tpu.matmul %38, %39, %cst_17 {dimension_numbers = #tpu.dot_dimension_numbers<[1], [0], [0], [1], [0, 0, 1, 1], [], []>} : vector<1024x128xbf16>, vector<128x16xbf16>, vector<1024x16xf32> -> vector<1024x16xf32>
    %cst_18 = arith.constant dense<0xFF800000> : vector<1024xf32>
    %41 = vector.multi_reduction <maximumf>, %40, %cst_18 [1] : vector<1024x16xf32> to vector<1024xf32>
    %42 = vector.shape_cast %41 : vector<1024xf32> to vector<1024x1xf32>
    %c0_19 = arith.constant 0 : index
    %c0_20 = arith.constant 0 : index
    %43 = vector.load %arg8[%c0_19, %c0_20] : memref<1024x1xf32, #tpu.memory_space<vmem>>, vector<1024x1xf32>
    %44 = arith.addf %42, %43 : vector<1024x1xf32>
    %cst_21 = arith.constant 0.000000e+00 : f32
    %45 = vector.broadcast %cst_21 : f32 to vector<1024x1xf32>
    %46 = arith.maximumf %44, %45 : vector<1024x1xf32>
    %c0_22 = arith.constant 0 : index
    %c0_23 = arith.constant 0 : index
    %c0_24 = arith.constant 0 : index
    %47 = vector.load %arg9[%c0_22, %c0_23, %c0_24] : memref<1x1024x1xf32, #tpu.memory_space<vmem>>, vector<1x1024x1xf32>
    %48 = vector.shape_cast %47 : vector<1x1024x1xf32> to vector<1024x1xf32>
    %49 = vector.shape_cast %46 : vector<1024x1xf32> to vector<1x1024x1xf32>
    tpu.vector_store %arg9[%c0_22, %c0_23, %c0_24], %49 {strides = array<i32>} : memref<1x1024x1xf32, #tpu.memory_space<vmem>>, vector<1x1024x1xf32>,
    return
  }
  func.func @transform_0(%arg0: i32, %arg1: i32) -> (i32, i32, i32) {
    %c0_i32 = arith.constant 0 : i32
    %c0_i32_0 = arith.constant 0 : i32
    return %arg0, %c0_i32, %arg1 : i32, i32, i32
  }
  func.func @transform_1(%arg0: i32, %arg1: i32) -> (i32, i32) {
    %c0_i32 = arith.constant 0 : i32
    %c0_i32_0 = arith.constant 0 : i32
    %c0_i32_1 = arith.constant 0 : i32
    return %c0_i32, %c0_i32_0 : i32, i32
  }
  func.func @transform_2(%arg0: i32, %arg1: i32) -> (i32, i32) {
    %c0_i32 = arith.constant 0 : i32
    %c0_i32_0 = arith.constant 0 : i32
    %c0_i32_1 = arith.constant 0 : i32
    return %c0_i32, %c0_i32_0 : i32, i32
  }
  func.func @transform_3(%arg0: i32, %arg1: i32) -> (i32, i32) {
    %c0_i32 = arith.constant 0 : i32
    %c0_i32_0 = arith.constant 0 : i32
    %c0_i32_1 = arith.constant 0 : i32
    return %c0_i32, %c0_i32_0 : i32, i32
  }
  func.func @transform_4(%arg0: i32, %arg1: i32) -> (i32, i32) {
    %c0_i32 = arith.constant 0 : i32
    %c0_i32_0 = arith.constant 0 : i32
    %c0_i32_1 = arith.constant 0 : i32
    return %c0_i32, %c0_i32_0 : i32, i32
  }
  func.func @transform_5(%arg0: i32, %arg1: i32) -> (i32, i32) {
    %c0_i32 = arith.constant 0 : i32
    %c0_i32_0 = arith.constant 0 : i32
    %c0_i32_1 = arith.constant 0 : i32
    return %c0_i32, %c0_i32_0 : i32, i32
  }
  func.func @transform_6(%arg0: i32, %arg1: i32) -> (i32, i32) {
    %c0_i32 = arith.constant 0 : i32
    %c0_i32_0 = arith.constant 0 : i32
    %c0_i32_1 = arith.constant 0 : i32
    return %c0_i32, %c0_i32_0 : i32, i32
  }
  func.func @transform_7(%arg0: i32, %arg1: i32) -> (i32, i32, i32) {
    %c0_i32 = arith.constant 0 : i32
    %c0_i32_0 = arith.constant 0 : i32
    %c0_i32_1 = arith.constant 0 : i32
    return %arg0, %c0_i32, %c0_i32_0 : i32, i32, i32
  }
}

</mosaic_0001>

<bundles_post_ra>
// kernel: tpu_custom_call.1
= control target key start
LH: loop header
LB: loop body
LE: loop exit
PB: predicated region body
PF: predicated region fallthrough
CT: control target
= control target key end

     0   :  { %s3456_s24 = smov 0   ;;  %s3458_s25 = smov 0   ;;  %s4732_s0 = inlined_call_operand.vmem [shape: f32[2,4,16], index: 0, kind: input, shape index: {}]   ;;  %s4733_s1 = inlined_call_operand.vmem [shape: f32[64,4], index: 1, kind: input, shape index: {}]   ;;  %s4734_s2 = inlined_call_operand.vmem [shape: f32[64,1], index: 2, kind: input, shape index: {}]   ;;  %s4735_s3 = inlined_call_operand.vmem [shape: bf16[128,64], index: 3, kind: input, shape index: {}]   ;;  %s4736_s4 = inlined_call_operand.vmem [shape: f32[128,1], index: 4, kind: input, shape index: {}]   ;;  %s4737_s5 = inlined_call_operand.vmem [shape: bf16[1024,128], index: 5, kind: input, shape index: {}]   ;;  %s4738_s6 = inlined_call_operand.vmem [shape: f32[1024,1], index: 6, kind: input, shape index: {}]   ;;  %s4739_s7 = inlined_call_operand.vmem [shape: f32[2,1024,1], index: 7, kind: output, shape index: {}]  }
   0x1   :  { %s3460_s26 = smov 0  }
   0x2 LB: > { %s29_s27 = sadd.s32 1, %s3406_s25  ;;  %p2908_p0 = scmp.ge.s32.totalorder %s3410_s26, 1  ;;  %s3410_s26 = sphi %s3460_s26, %s17_s26   ;;  %s3406_s25 = sphi %s3458_s25, %s4741_s25   ;;  %s3402_s24 = sphi %s3456_s24, %s4740_s24  }
   0x3   : > { %p31_p1 = scmp.ge.s32.totalorder %s29_s27, 2  ;;  %p253_p2 = scmp.lt.s32.totalorder %s3410_s26, 3 }
   0x5   : > { %s4743_s27 = smov (%p31_p1, %s29_s27), 0  ;;  %p254_p3 = pnand %p2908_p0, %p253_p2 }
   0x6   : > { %p287_p4 = scmp.lt.s32.totalorder (!%p254_p3), %s3402_s24, 1 }
   0x7   : > { %257 = sbr.rel (%p254_p3) target bundleno = 1114 (0x45a), region = 48 }
   0xc   : > { %v313_v0 = vld [vmem:[%s4733_s1 + $0x20] sm:$0xff]  ;;  %v307_v1 = vld [vmem:[%s4734_s2 + $0x30] sm:$0xff]  ;;  %v3412_v2 = vmov 2   ;;  %v3413_v3 = vmov 0   ;;  %v308_v4 = vld [vmem:[%s4734_s2 + $0x38] sm:$0xff]  ;;  %v3414_v7 = vmov 1   ;;  %v357_v30 = vlaneseq }
   0xd   : > { %3299 = vset.pattern.permute.xlu0 %v3412_v2  ;;  %3291 = vset.pattern.permute.xlu1 %v3413_v3  ;;  %v315_v5 = vld [vmem:[%s4733_s1 + $0x30] sm:$0xff]  ;;  %v316_v6 = vld [vmem:[%s4733_s1 + $0x38] sm:$0xff]  ;;  %v314_v8 = vld [vmem:[%s4733_s1 + $0x28] sm:$0xff]  ;;  %v3415_v14 = vmov 3   ;;  %vm737_vm0 = vcmask 523264   ;;  %s4745_s24 = smov (!%p287_p4, %s3402_s24), 1 }
   0xe   : > { %486 = vperm.xlu0 %3299, %v313_v0   ;;  %401 = vperm.xlu1 %3291, %v307_v1   ;;  %v305_v9 = vld [vmem:[%s4734_s2 + $0x20] sm:$0xff]  ;;  %v304_v10 = vld [vmem:[%s4734_s2 + $0x18] sm:$0xff]  ;;  %v310_v11 = vld [vmem:[%s4733_s1 + $0x8] sm:$0xff]  ;;  %s2909_s20 = sshll.u32 %s4745_s24, 2  ;;  %v358_v33 = vshrl.u32 %v357_v30, 7  ;;  %vm1940_vm1 = vcmask 130048  }
   0xf   : > { %v306_v12 = vld [vmem:[%s4734_s2 + $0x28] sm:$0xff]  ;;  %v301_v13 = vld [vmem:[%s4734_s2] sm:$0xff]  ;;  %v311_v16 = vld [vmem:[%s4733_s1 + $0x10] sm:$0xff]  ;;  %s293_s8 = scalar_lea.vmem %s4732_s0, %s2909_s20  ;;  %s2994_s10 = sshll.u32 %s4745_s24, 10  ;;  %vm2709_vm2 = vcmask 7168  }
  0x10   : > { %v309_v15 = vld [vmem:[%s4733_s1] sm:$0xff]  ;;  %v312_v17 = vld [vmem:[%s4733_s1 + $0x18] sm:$0xff]  ;;  %v303_v18 = vld [vmem:[%s4734_s2 + $0x10] sm:$0xff]  ;;  %v359_v40 = vsub.s32 0, %v358_v33  ;;  %v451_v47 = vsub.s32 1, %v358_v33  ;;  %v503_v51 = vsub.s32 2, %v358_v33  ;;  %s3983_s15 = scalar_lea.vmem %s4739_s7, %s2994_s10 }
  0x11   : > { %v302_v19 = vld [vmem:[%s4734_s2 + $0x8] sm:$0xff]  ;;  %v3316_v20 = vld [vmem:[%s4735_s3] sm:$0xff]   ;;  %v616_v35 = vld [vmem:[%s4736_s4 + $0x78] sm:$0xff]  ;;  %v555_v56 = vsub.s32 3, %v358_v33 }
  0x12   : > { %3300 = vset.pattern.permute.xlu0 %v3413_v3  ;;  %406 = vperm.xlu1 %3291, %v308_v4   ;;  %v615_v36 = vld [vmem:[%s4736_s4 + $0x70] sm:$0xff]  ;;  %v613_v38 = vld [vmem:[%s4736_s4 + $0x60] sm:$0xff]  ;;  %v614_v39 = vld [vmem:[%s4736_s4 + $0x68] sm:$0xff] }
  0x13   : > { %349 = vperm.xlu0 %3300, %v315_v5   ;;  %3087 = vmatprep.mubr.msk.bf16.mxu0 %vm737_vm0, %v3316_v20  ;;  %v300_v41 = vld [vmem:[%s293_s8] sm:$0xf]  ;;  %v611_v44 = vld [vmem:[%s4736_s4 + $0x50] sm:$0xff]  ;;  %v612_v45 = vld [vmem:[%s4736_s4 + $0x58] sm:$0xff] }
  0x14   : > { %v3585_v46 = vrot.slane %v300_v41, %v359_v40  ;;  %v609_v49 = vld [vmem:[%s4736_s4 + $0x40] sm:$0xff]  ;;  %v610_v50 = vld [vmem:[%s4736_s4 + $0x48] sm:$0xff]  ;;  %v3596_v53 = vrot.slane %v300_v41, %v451_v47  ;;  %v607_v57 = vld [vmem:[%s4736_s4 + $0x30] sm:$0xff]  ;;  %v3605_v59 = vrot.slane %v300_v41, %v503_v51  ;;  %v3608_v1 = vrot.slane %v300_v41, %v555_v56 }
  0x15   : > { %v608_v58 = vld [vmem:[%s4736_s4 + $0x38] sm:$0xff]  ;;  %v601_v20 = vld [vmem:[%s4736_s4] sm:$0xff] }
  0x16   : > { %3292 = vset.pattern.permute.xlu1 %v3414_v7 }
  0x17   : > { %354 = vperm.xlu0 %3300, %v316_v6   ;;  %446 = vperm.xlu1 %3292, %v316_v6  }
  0x1b   : > { %344 = vperm.xlu0 %3300, %v314_v8   ;;  %3293 = vset.pattern.permute.xlu1 %v3413_v3 }
  0x1c   : > { %339 = vperm.xlu1 %3293, %v313_v0  }
  0x1f   : > { %391 = vperm.xlu0 %3300, %v305_v9  }
  0x20   : > { %3294 = vset.pattern.permute.xlu1 %v3412_v2 }
  0x21   : > { %494 = vperm.xlu1 %3294, %v315_v5  }
  0x23   : > { %386 = vperm.xlu0 %3300, %v304_v10  }
  0x25   : > { %498 = vperm.xlu1 %3294, %v316_v6  }
  0x27   : > { %324 = vperm.xlu0 %3300, %v310_v11  }
  0x29   : > { %3295 = vset.pattern.permute.xlu1 %v3413_v3 }
  0x2a   : > { %396 = vperm.xlu1 %3295, %v306_v12   ;;  %v603_v12 = vld [vmem:[%s4736_s4 + $0x10] sm:$0xff] }
  0x2b   : > { %371 = vperm.xlu0 %3300, %v301_v13   ;;  %v604_v13 = vld [vmem:[%s4736_s4 + $0x18] sm:$0xff] }
  0x2e   : > { %3296 = vset.pattern.permute.xlu1 %v3414_v7 }
  0x2f   : > { %438 = vperm.xlu1 %3296, %v314_v8   ;;  %3307 = vset.pattern.permute.xlu0 %v3414_v7 }
  0x30   : > { %442 = vperm.xlu0 %3307, %v315_v5  }
  0x33   : > { %3297 = vset.pattern.permute.xlu1 %v3415_v14 }
  0x34   : > { %546 = vperm.xlu1 %3297, %v315_v5   ;;  %434 = vperm.xlu0 %3307, %v313_v0  }
  0x38   : > { %3298 = vset.pattern.permute.xlu1 %v3413_v3  ;;  %418 = vperm.xlu0 %3307, %v309_v15  }
  0x39   : > { %329 = vperm.xlu1 %3298, %v311_v16  }
  0x3c   : > { %3309 = vset.pattern.permute.xlu0 %v3415_v14 }
  0x3d   : > { %334 = vperm.xlu1 %3298, %v312_v17   ;;  %550 = vperm.xlu0 %3309, %v316_v6  }
  0x41   : > { %3301 = vset.pattern.permute.xlu1 %v3412_v2  ;;  %538 = vperm.xlu0 %3309, %v313_v0  }
  0x42   : > { %490 = vperm.xlu1 %3301, %v314_v8  }
  0x45   : > { %534 = vperm.xlu0 %3309, %v312_v17  }
  0x46   : > { %3302 = vset.pattern.permute.xlu1 %v3413_v3 }
  0x47   : > { %381 = vperm.xlu1 %3302, %v303_v18  }
  0x49   : > { %522 = vperm.xlu0 %3309, %v309_v15  }
  0x4b   : > { %3303 = vset.pattern.permute.xlu1 %v3414_v7 }
  0x4c   : > { %426 = vperm.xlu1 %3303, %v311_v16  }
  0x4d   : > { %3314 = vset.pattern.permute.xlu0 %v3413_v3 }
  0x4e   : > { %689 = vperm.xlu0 %3314, %v615_v36  }
  0x50   : > { %430 = vperm.xlu1 %3303, %v312_v17  }
  0x52   : > { %684 = vperm.xlu0 %3314, %v614_v39  }
  0x54   : > { %3304 = vset.pattern.permute.xlu1 %v3415_v14 }
  0x55   : > { %542 = vperm.xlu1 %3304, %v314_v8  }
  0x56   : > { %674 = vperm.xlu0 %3314, %v612_v45  }
  0x59   : > { %3305 = vset.pattern.permute.xlu1 %v3413_v3 }
  0x5a   : > { %319 = vperm.xlu1 %3305, %v309_v15   ;;  %664 = vperm.xlu0 %3314, %v610_v50  }
  0x5e   : > { %3306 = vset.pattern.permute.xlu1 %v3412_v2  ;;  %654 = vperm.xlu0 %3314, %v608_v58  }
  0x5f   : > { %478 = vperm.xlu1 %3306, %v311_v16  }
  0x63   : > { %482 = vperm.xlu1 %3306, %v312_v17  }
  0x67   : > { %3308 = vset.pattern.permute.xlu1 %v3413_v3 }
  0x68   : > { %376 = vperm.xlu1 %3308, %v302_v19  }
  0x6c   : > { %3310 = vset.pattern.permute.xlu1 %v3414_v7 }
  0x6d   : > { %422 = vperm.xlu1 %3310, %v310_v11  }
  0x71   : > { %3311 = vset.pattern.permute.xlu1 %v3415_v14 }
  0x72   : > { %530 = vperm.xlu1 %3311, %v311_v16  }
  0x76   : > { %3312 = vset.pattern.permute.xlu1 %v3412_v2  ;;  %v605_v2 = vld [vmem:[%s4736_s4 + $0x20] sm:$0xff] }
  0x77   : > { %470 = vperm.xlu1 %3312, %v309_v15  }
  0x7b   : > { %474 = vperm.xlu1 %3312, %v310_v11  }
  0x7f   : > { %3313 = vset.pattern.permute.xlu1 %v3415_v14 }
  0x80   : > { %526 = vperm.xlu1 %3313, %v310_v11  }
  0x84   : > { %3315 = vset.pattern.permute.xlu1 %v3413_v3  ;;  %v606_v3 = vld [vmem:[%s4736_s4 + $0x28] sm:$0xff] }
  0x85   : > { %694 = vperm.xlu1 %3315, %v616_v35   ;;  %644 = vperm.xlu0 %3314, %v606_v3  }
  0x89   : > { %v402_v21 = vpop.permute.xlu1 %401  ;;  %v3543_v22 = vpop.permute.xlu0 %486  ;;  %679 = vperm.xlu1 %3315, %v613_v38   ;;  %634 = vperm.xlu0 %3314, %v604_v13  }
  0x8a   : > { %v509_v40 = vmul.f32 %v3605_v59, %v3543_v22 }
  0x8d   : > { %v407_v23 = vpop.permute.xlu1 %406  ;;  %669 = vperm.xlu1 %3315, %v611_v44  }
  0x8e   : > { %v350_v24 = vpop.permute.xlu0 %349 }
  0x8f   : > { %v367_v52 = vmul.f32 %v3585_v46, %v350_v24 }
  0x91   : > { %659 = vperm.xlu1 %3315, %v609_v49   ;;  %v415_v60 = vadd.f32 %v402_v21, %v367_v52  ;;  %v602_v21 = vld [vmem:[%s4736_s4 + $0x8] sm:$0xff] }
  0x92   : > { %v355_v25 = vpop.permute.xlu0 %354  ;;  %v447_v26 = vpop.permute.xlu1 %446  ;;  %624 = vperm.xlu0 %3314, %v602_v21  }
  0x93   : > { %v368_v61 = vmul.f32 %v3585_v46, %v355_v25  ;;  %v460_v7 = vmul.f32 %v3596_v53, %v447_v26 }
  0x95   : > { %649 = vperm.xlu1 %3315, %v607_v57   ;;  %v416_v4 = vadd.f32 %v407_v23, %v368_v61 }
  0x96   : > { %v3546_v27 = vpop.permute.xlu0 %344 }
  0x97   : > { %v3548_v28 = vpop.permute.xlu1 %339  ;;  %v468_v14 = vadd.f32 %v460_v7, %v416_v4  ;;  %v366_v36 = vmul.f32 %v3585_v46, %v3546_v27 }
  0x98   : > { %v365_v33 = vmul.f32 %v3585_v46, %v3548_v28 }
  0x99   : > { %639 = vperm.xlu1 %3315, %v605_v2  }
  0x9a   : > { %v3553_v29 = vpop.permute.xlu0 %391 }
  0x9b   : > { %v413_v38 = vadd.f32 %v3553_v29, %v365_v33 }
  0x9c   : > { %v495_v31 = vpop.permute.xlu1 %494 }
  0x9d   : > { %v511_v5 = vmul.f32 %v3605_v59, %v495_v31  ;;  %629 = vperm.xlu1 %3315, %v603_v12  }
  0x9e   : > { %v3556_v32 = vpop.permute.xlu0 %386 }
  0xa0   : > { %v499_v34 = vpop.permute.xlu1 %498 }
  0xa1   : > { %v512_v9 = vmul.f32 %v3605_v59, %v499_v34  ;;  %619 = vperm.xlu1 %3315, %v601_v20  }
  0xa2   : > { %v3567_v37 = vpop.permute.xlu0 %324 }
  0xa3   : > { %v520_v17 = vadd.f32 %v512_v9, %v468_v14 }
  0xa5   : > { %v3575_v42 = vpop.permute.xlu1 %396 }
  0xa6   : > { %v3577_v43 = vpop.permute.xlu0 %371  ;;  %v414_v47 = vadd.f32 %v3575_v42, %v366_v36 }
  0xaa   : > { %v3587_v48 = vpop.permute.xlu1 %438 }
  0xab   : > { %v443_v54 = vpop.permute.xlu0 %442  ;;  %v458_v41 = vmul.f32 %v3596_v53, %v3587_v48 }
  0xac   : > { %v459_v55 = vmul.f32 %v3596_v53, %v443_v54 }
  0xad   : > { %v466_v50 = vadd.f32 %v458_v41, %v414_v47  ;;  %v3317_v47 = vld [vmem:[%s4735_s3 + $0x8] sm:$0xff]  }
  0xae   : > { %v467_v0 = vadd.f32 %v459_v55, %v415_v60 }
  0xaf   : > { %v547_v62 = vpop.permute.xlu1 %546  ;;  %v435_v63 = vpop.permute.xlu0 %434 }
  0xb0   : > { %v519_v10 = vadd.f32 %v511_v5, %v467_v0  ;;  %v563_v11 = vmul.f32 %v3608_v1, %v547_v62  ;;  %v457_v34 = vmul.f32 %v3596_v53, %v435_v63 }
  0xb2   : > { %v571_v18 = vadd.f32 %v563_v11, %v519_v10  ;;  %v465_v44 = vadd.f32 %v457_v34, %v413_v38 }
  0xb3   : > { %v3617_v6 = vpop.permute.xlu0 %418 }
  0xb4   : > { %v330_v8 = vpop.permute.xlu1 %329  ;;  %v579_v25 = vmax.f32 %v571_v18, 0.0  ;;  %v517_v51 = vadd.f32 %v509_v40, %v465_v44 }
  0xb5   : > { %v363_v3 = vmul.f32 %v3585_v46, %v330_v8  ;;  %v453_v8 = vmul.f32 %v3596_v53, %v3617_v6 }
  0xb8   : > { %v335_v15 = vpop.permute.xlu1 %334  ;;  %v551_v16 = vpop.permute.xlu0 %550 }
  0xb9   : > { %v564_v19 = vmul.f32 %v3608_v1, %v551_v16  ;;  %v364_v60 = vmul.f32 %v3585_v46, %v335_v15 }
  0xbb   : > { %v572_v23 = vadd.f32 %v564_v19, %v520_v17  ;;  %v412_v63 = vadd.f32 %v3556_v32, %v364_v60 }
  0xbc   : > { %v539_v39 = vpop.permute.xlu0 %538 }
  0xbd   : > { %v491_v24 = vpop.permute.xlu1 %490  ;;  %v580_v26 = vmax.f32 %v572_v23, 0.0  ;;  %v561_v28 = vmul.f32 %v3608_v1, %v539_v39 }
  0xbe   : > { %v510_v49 = vmul.f32 %v3605_v59, %v491_v24 }
  0xbf   : > { %v600_v30 = vpack.c.bf16 %v580_v26, %v579_v25  ;;  %v569_v52 = vadd.f32 %v561_v28, %v517_v51  ;;  %v362_v26 = vmul.f32 %v3585_v46, %v3567_v37  ;;  %v3320_v28 = vld [vmem:[%s4735_s3 + $0x20] sm:$0xff]   ;;  %v3323_v51 = vld [vmem:[%s4735_s3 + $0x38] sm:$0xff]  }
  0xc0   : > { %v518_v29 = vadd.f32 %v510_v49, %v466_v50  ;;  %v535_v2 = vpop.permute.xlu0 %534  ;;  %v3321_v49 = vld [vmem:[%s4735_s3 + $0x28] sm:$0xff]   ;;  %v3322_v50 = vld [vmem:[%s4735_s3 + $0x30] sm:$0xff]  }
  0xc1   : > { %3079 = vmatprep.subr.bf16.mxu0 %v600_v30  ;;  %v577_v22 = vmax.f32 %v569_v52, 0.0  ;;  %v560_v12 = vmul.f32 %v3608_v1, %v535_v2  ;;  %v3326_v52 = vld [vmem:[%s4737_s5 + $0xf0] sm:$0xff]  }
  0xc2   : > { %v382_v31 = vpop.permute.xlu1 %381  ;;  %3080 = vmatpush3.bf16.msra.mxu0 %v600_v30  ;;  %3179 = vmatprep.mubr.bf16.mxu1 %v3326_v52 }
  0xc3   : > { %v411_v9 = vadd.f32 %v382_v31, %v363_v3 }
  0xc4   : > { %v523_v34 = vpop.permute.xlu0 %522 }
  0xc5   : > { %v557_v38 = vmul.f32 %v3608_v1, %v523_v34 }
  0xc7   : > { %v427_v35 = vpop.permute.xlu1 %426 }
  0xc8   : > { %v455_v4 = vmul.f32 %v3596_v53, %v427_v35 }
  0xca   : > { %v463_v13 = vadd.f32 %v455_v4, %v411_v9 }
  0xcb   : > { %v431_v45 = vpop.permute.xlu1 %430 }
  0xcc   : > { %v456_v62 = vmul.f32 %v3596_v53, %v431_v45 }
  0xce   : > { %v464_v5 = vadd.f32 %v456_v62, %v412_v63 }
  0xd0   : > { %v543_v27 = vpop.permute.xlu1 %542 }
  0xd1   : > { %v562_v54 = vmul.f32 %v3608_v1, %v543_v27  ;;  %v3324_v27 = vld [vmem:[%s4737_s5] sm:$0xff]  }
  0xd3   : > { %v570_v55 = vadd.f32 %v562_v54, %v518_v29 }
  0xd5   : > { %v578_v56 = vmax.f32 %v570_v55, 0.0  ;;  %v320_v57 = vpop.permute.xlu1 %319 }
  0xd6   : > { %v361_v15 = vmul.f32 %v3585_v46, %v320_v57 }
  0xd7   : > { %v599_v48 = vpack.c.bf16 %v578_v56, %v577_v22  ;;  %v690_v22 = vpop.permute.xlu0 %689 }
  0xd8   : > { %v409_v19 = vadd.f32 %v3577_v43, %v361_v15 }
  0xd9   : > { %3081 = vmatprep.subr.bf16.mxu0 %v599_v48 }
  0xda   : > { %v479_v58 = vpop.permute.xlu1 %478  ;;  %3082 = vmatpush3.bf16.msra.mxu0 %v599_v48  ;;  %v461_v31 = vadd.f32 %v453_v8, %v409_v19 }
  0xdb   : > { %v507_v10 = vmul.f32 %v3605_v59, %v479_v58 }
  0xdd   : > { %v515_v32 = vadd.f32 %v507_v10, %v463_v13 }
  0xde   : > { %v483_v42 = vpop.permute.xlu1 %482 }
  0xdf   : > { %v508_v0 = vmul.f32 %v3605_v59, %v483_v42  ;;  %v685_v42 = vpop.permute.xlu0 %684 }
  0xe1   : > { %v516_v11 = vadd.f32 %v508_v0, %v464_v5 }
  0xe3   : > { %v377_v61 = vpop.permute.xlu1 %376  ;;  %v568_v16 = vadd.f32 %v560_v12, %v516_v11  ;;  %v675_v0 = vpop.permute.xlu0 %674 }
  0xe4   : > { %v410_v35 = vadd.f32 %v377_v61, %v362_v26 }
  0xe5   : > { %v576_v20 = vmax.f32 %v568_v16, 0.0 }
  0xe8   : > { %v423_v7 = vpop.permute.xlu1 %422 }
  0xe9   : > { %v454_v30 = vmul.f32 %v3596_v53, %v423_v7  ;;  %v665_v7 = vpop.permute.xlu0 %664 }
  0xeb   : > { %v462_v36 = vadd.f32 %v454_v30, %v410_v35 }
  0xed   : > { %v531_v14 = vpop.permute.xlu1 %530 }
  0xee   : > { %v559_v17 = vmul.f32 %v3608_v1, %v531_v14 }
  0xf0   : > { %v567_v18 = vadd.f32 %v559_v17, %v515_v32  ;;  %v655_v32 = vpop.permute.xlu0 %654 }
  0xf2   : > { %v575_v21 = vmax.f32 %v567_v18, 0.0  ;;  %v471_v23 = vpop.permute.xlu1 %470 }
  0xf3   : > { %v505_v24 = vmul.f32 %v3605_v59, %v471_v23 }
  0xf4   : > { %v598_v25 = vpack.c.bf16 %v576_v20, %v575_v21 }
  0xf5   : > { %v513_v6 = vadd.f32 %v505_v24, %v461_v31 }
  0xf6   : > { %v475_v33 = vpop.permute.xlu1 %474  ;;  %3083 = vmatprep.subr.bf16.mxu0 %v598_v25 }
  0xf7   : > { %3084 = vmatpush3.bf16.msra.mxu0 %v598_v25  ;;  %v506_v43 = vmul.f32 %v3605_v59, %v475_v33  ;;  %v565_v40 = vadd.f32 %v557_v38, %v513_v6  ;;  %v3318_v59 = vld [vmem:[%s4735_s3 + $0x10] sm:$0xff]  }
  0xf9   : > { %v514_v41 = vadd.f32 %v506_v43, %v462_v36  ;;  %v573_v53 = vmax.f32 %v565_v40, 0.0 }
  0xfb   : > { %v527_v39 = vpop.permute.xlu1 %526 }
  0xfc   : > { %v558_v44 = vmul.f32 %v3608_v1, %v527_v39  ;;  %v3319_v1 = vld [vmem:[%s4735_s3 + $0x18] sm:$0xff]  }
  0xfe   : > { %v566_v37 = vadd.f32 %v558_v44, %v514_v41 }
 0x100   : > { %v574_v46 = vmax.f32 %v566_v37, 0.0  ;;  %v695_v57 = vpop.permute.xlu1 %694  ;;  %v645_v33 = vpop.permute.xlu0 %644 }
 0x102   : > { %v597_v45 = vpack.c.bf16 %v574_v46, %v573_v53 }
 0x104   : > { %3085 = vmatprep.subr.bf16.mxu0 %v597_v45  ;;  %v680_v61 = vpop.permute.xlu1 %679  ;;  %v635_v41 = vpop.permute.xlu0 %634 }
 0x105   : > { %3086 = vmatpush3.bf16.msra.mxu0 %v597_v45 }
 0x108   : > { %3088 = vmatmul.mubr.msk.bf16.vlgmr.msra.gmra.mxu0 %vm737_vm0, %v3317_v47  ;;  %v670_v3 = vpop.permute.xlu1 %669 }
 0x109   : > { %3091 = vmatprep.mubr.msk.bf16.mxu0 %vm737_vm0, %v3318_v59 }
 0x10c   : > { %v660_v10 = vpop.permute.xlu1 %659 }
 0x110   : > { %3092 = vmatmul.mubr.msk.bf16.gmra.mxu0 %vm737_vm0, %v3319_v1  ;;  %v650_v20 = vpop.permute.xlu1 %649 }
 0x111   : > { %3095 = vmatprep.mubr.msk.bf16.mxu0 %vm737_vm0, %v3320_v28 }
 0x114   : > { %v640_v6 = vpop.permute.xlu1 %639 }
 0x118   : > { %3096 = vmatmul.mubr.msk.bf16.gmra.mxu0 %vm737_vm0, %v3321_v49  ;;  %v630_v53 = vpop.permute.xlu1 %629  ;;  %v625_v49 = vpop.permute.xlu0 %624 }
 0x119   : > { %3099 = vmatprep.mubr.msk.bf16.mxu0 %vm737_vm0, %v3322_v50 }
 0x120   : > { %3100 = vmatmul.mubr.msk.bf16.gmra.mxu0 %vm737_vm0, %v3323_v51 }
 0x121   : > { %3119 = vmatprep.mubr.bf16.mxu0 %v3324_v27  ;;  %v620_v27 = vpop.permute.xlu1 %619 }
 0x1c8   : > { %v3703_v29 = vpop.f32.mrf.mxu0 }
 0x1c9   : > { %v805_v50 = vadd.f32 %v3703_v29, %v630_v53  ;;  %v3371_v53 = vld [vmem:[%s4737_s5 + $0x1a8] sm:$0xff]  }
 0x1ca   : > { %v3705_v54 = vpop.f32.mrf.mxu0 }
 0x1cc   : > { %v3707_v55 = vpop.f32.mrf.mxu0 }
 0x1cd   : > { %v808_v59 = vadd.f32 %v3707_v55, %v635_v41  ;;  %v797_v55 = vadd.f32 %v3705_v54, %v620_v27  ;;  %v3327_v54 = vld [vmem:[%s4737_s5 + $0xf8] sm:$0xff]   ;;  %v3380_v27 = vld [vmem:[%s4737_s5 + $0xe0] sm:$0xff]  }
 0x1ce   : > { %v3709_v56 = vpop.f32.mrf.mxu0  ;;  %v3367_v41 = vld [vmem:[%s4737_s5 + $0x198] sm:$0xff]  }
 0x1cf   : > { %v862_v52 = vmax.f32 %v808_v59, 0.0  ;;  %v859_v29 = vmax.f32 %v797_v55, 0.0  ;;  %v3373_v59 = vld [vmem:[%s4737_s5 + $0xc8] sm:$0xff]  }
 0x1d0   : > { %v3093_v48 = vpop.f32.mrf.mxu0  ;;  %v3385_v55 = vld [vmem:[%s4737_s5 + $0x1e8] sm:$0xff]  }
 0x1d1   : > { %v821_v39 = vadd.f32 %v3093_v48, %v650_v20  ;;  %v861_v48 = vmax.f32 %v805_v50, 0.0  ;;  %v3349_v20 = vld [vmem:[%s4737_s5 + $0x68] sm:$0xff]   ;;  %v3377_v50 = vld [vmem:[%s4737_s5 + $0xd8] sm:$0xff]  }
 0x1d2   : > { %v812_v58 = vpop.f32.mrf.mxu0 }
 0x1d3   : > { %v865_v45 = vmax.f32 %v821_v39, 0.0  ;;  %v813_v47 = vadd.f32 %v812_v58, %v640_v6  ;;  %v1004_v58 = vpack.c.bf16 %v862_v52, %v861_v48  ;;  %v3362_v6 = vld [vmem:[%s4737_s5 + $0x180] sm:$0xff]   ;;  %v3366_v39 = vld [vmem:[%s4737_s5 + $0x190] sm:$0xff]  }
 0x1d4   : > { %v3094_v60 = vpop.f32.mrf.mxu0  ;;  %v3382_v52 = vld [vmem:[%s4737_s5 + $0x1d0] sm:$0xff]   ;;  %v3384_v48 = vld [vmem:[%s4737_s5 + $0x1e0] sm:$0xff]  }
 0x1d5   : > { %v824_v43 = vadd.f32 %v3094_v60, %v655_v32  ;;  %v863_v51 = vmax.f32 %v813_v47, 0.0  ;;  %v3344_v32 = vld [vmem:[%s4737_s5 + $0x50] sm:$0xff]  }
 0x1d6   : > { %v815_v62 = vpop.f32.mrf.mxu0  ;;  %v3374_v47 = vld [vmem:[%s4737_s5 + $0x1b0] sm:$0xff]  }
 0x1d7   : > { %v866_v44 = vmax.f32 %v824_v43, 0.0  ;;  %v816_v37 = vadd.f32 %v815_v62, %v645_v33  ;;  %v3330_v62 = vld [vmem:[%s4737_s5 + $0x100] sm:$0xff]   ;;  %v3357_v33 = vld [vmem:[%s4737_s5 + $0x88] sm:$0xff]   ;;  %v3361_v43 = vld [vmem:[%s4737_s5 + $0x98] sm:$0xff]  }
 0x1d8   : > { %v3097_v63 = vpop.f32.mrf.mxu0 }
 0x1d9   : > { %v837_v21 = vadd.f32 %v3097_v63, %v670_v3  ;;  %v1006_v1 = vpack.c.bf16 %v866_v44, %v865_v45  ;;  %v864_v28 = vmax.f32 %v816_v37, 0.0  ;;  %v3329_v63 = vld [vmem:[%s4737_s5 + $0x18] sm:$0xff]   ;;  %v3334_v3 = vld [vmem:[%s4737_s5 + $0x110] sm:$0xff]   ;;  %v3370_v37 = vld [vmem:[%s4737_s5 + $0x1a0] sm:$0xff]  }
 0x1da   : > { %v828_v2 = vpop.f32.mrf.mxu0  ;;  %v3368_v44 = vld [vmem:[%s4737_s5 + $0xb0] sm:$0xff]   ;;  %v3372_v45 = vld [vmem:[%s4737_s5 + $0xc0] sm:$0xff]  }
 0x1db   : > { %v869_v34 = vmax.f32 %v837_v21, 0.0  ;;  %v829_v35 = vadd.f32 %v828_v2, %v660_v10  ;;  %v3332_v2 = vld [vmem:[%s4737_s5 + $0x20] sm:$0xff]   ;;  %v3337_v10 = vld [vmem:[%s4737_s5 + $0x38] sm:$0xff]  }
 0x1dc   : > { %v3098_v4 = vpop.f32.mrf.mxu0  ;;  %v3351_v21 = vld [vmem:[%s4737_s5 + $0x158] sm:$0xff]  }
 0x1dd   : > { %v840_v17 = vadd.f32 %v3098_v4, %v675_v0  ;;  %v867_v40 = vmax.f32 %v829_v35, 0.0  ;;  %v3331_v0 = vld [vmem:[%s4737_s5 + $0x108] sm:$0xff]   ;;  %v3360_v35 = vld [vmem:[%s4737_s5 + $0x90] sm:$0xff]  }
 0x1de   : > { %v831_v5 = vpop.f32.mrf.mxu0  ;;  %v3333_v4 = vld [vmem:[%s4737_s5 + $0x28] sm:$0xff]  }
 0x1df   : > { %v870_v26 = vmax.f32 %v840_v17, 0.0  ;;  %v832_v30 = vadd.f32 %v831_v5, %v665_v7  ;;  %v3335_v5 = vld [vmem:[%s4737_s5 + $0x118] sm:$0xff]   ;;  %v3336_v7 = vld [vmem:[%s4737_s5 + $0x30] sm:$0xff]  }
 0x1e0   : > { %v3101_v9 = vpop.f32.mrf.mxu0  ;;  %v3345_v17 = vld [vmem:[%s4737_s5 + $0x58] sm:$0xff]  }
 0x1e1   : > { %v853_v12 = vadd.f32 %v3101_v9, %v690_v22  ;;  %v1008_v36 = vpack.c.bf16 %v870_v26, %v869_v34  ;;  %v868_v38 = vmax.f32 %v832_v30, 0.0  ;;  %v800_v22 = vadd.f32 %v3709_v56, %v625_v49  ;;  %v3325_v56 = vld [vmem:[%s4737_s5 + $0x8] sm:$0xff]   ;;  %v3338_v9 = vld [vmem:[%s4737_s5 + $0x120] sm:$0xff]   ;;  %v3359_v34 = vld [vmem:[%s4737_s5 + $0x178] sm:$0xff]  }
 0x1e2   : > { %v844_v11 = vpop.f32.mrf.mxu0  ;;  %v3355_v26 = vld [vmem:[%s4737_s5 + $0x168] sm:$0xff]   ;;  %v3356_v30 = vld [vmem:[%s4737_s5 + $0x80] sm:$0xff]  }
 0x1e3   : > { %v845_v14 = vadd.f32 %v844_v11, %v680_v61  ;;  %v873_v18 = vmax.f32 %v853_v12, 0.0  ;;  %v1007_v46 = vpack.c.bf16 %v868_v38, %v867_v40  ;;  %v3328_v61 = vld [vmem:[%s4737_s5 + $0x10] sm:$0xff]   ;;  %v3339_v11 = vld [vmem:[%s4737_s5 + $0x128] sm:$0xff]   ;;  %v3340_v12 = vld [vmem:[%s4737_s5 + $0x40] sm:$0xff]  }
 0x1e4   : > { %v3102_v13 = vpop.f32.mrf.mxu0  ;;  %v3364_v38 = vld [vmem:[%s4737_s5 + $0xa0] sm:$0xff]   ;;  %v3365_v40 = vld [vmem:[%s4737_s5 + $0xa8] sm:$0xff]  }
 0x1e5   : > { %v856_v15 = vadd.f32 %v3102_v13, %v695_v57  ;;  %v871_v23 = vmax.f32 %v845_v14, 0.0  ;;  %v1005_v57 = vpack.c.bf16 %v864_v28, %v863_v51  ;;  %v3342_v13 = vld [vmem:[%s4737_s5 + $0x130] sm:$0xff]   ;;  %v3341_v14 = vld [vmem:[%s4737_s5 + $0x48] sm:$0xff]   ;;  %v3378_v49 = vld [vmem:[%s4737_s5 + $0x1c0] sm:$0xff]  }
 0x1e6   : > { %v847_v16 = vpop.f32.mrf.mxu0  ;;  %v3376_v28 = vld [vmem:[%s4737_s5 + $0xd0] sm:$0xff]   ;;  %v3379_v51 = vld [vmem:[%s4737_s5 + $0x1c8] sm:$0xff]  }
 0x1e7   : > { %v874_v8 = vmax.f32 %v856_v15, 0.0  ;;  %v848_v19 = vadd.f32 %v847_v16, %v685_v42  ;;  %v860_v42 = vmax.f32 %v800_v22, 0.0  ;;  %v3343_v15 = vld [vmem:[%s4737_s5 + $0x138] sm:$0xff]   ;;  %v3346_v16 = vld [vmem:[%s4737_s5 + $0x140] sm:$0xff]   ;;  %v3381_v22 = vld [vmem:[%s4737_s5 + $0xe8] sm:$0xff]  }
 0x1e9   : > { %v1010_v24 = vpack.c.bf16 %v874_v8, %v873_v18  ;;  %v872_v25 = vmax.f32 %v848_v19, 0.0  ;;  %v1003_v60 = vpack.c.bf16 %v860_v42, %v859_v29  ;;  %v3347_v18 = vld [vmem:[%s4737_s5 + $0x148] sm:$0xff]   ;;  %v3348_v8 = vld [vmem:[%s4737_s5 + $0x60] sm:$0xff]   ;;  %v3350_v19 = vld [vmem:[%s4737_s5 + $0x150] sm:$0xff]  }
 0x1ea   : > { %v3387_v42 = vld [vmem:[%s4737_s5 + $0x1f8] sm:$0xff]  }
 0x1eb   : > { %v1009_v31 = vpack.c.bf16 %v872_v25, %v871_v23  ;;  %3103 = vmatprep.subr.bf16.mxu0 %v1010_v24  ;;  %3247 = vmatprep.subr.bf16.mxu1 %v1010_v24  ;;  %v3352_v23 = vld [vmem:[%s4737_s5 + $0x70] sm:$0xff]   ;;  %v3353_v25 = vld [vmem:[%s4737_s5 + $0x78] sm:$0xff]  }
 0x1ec   : > { %3104 = vmatpush3.bf16.msra.mxu0 %v1010_v24  ;;  %3255 = vmatpush3.bf16.msra.mxu1 %v1010_v24  ;;  %v3354_v24 = vld [vmem:[%s4737_s5 + $0x160] sm:$0xff]  }
 0x1ed   : > { %3105 = vmatprep.subr.bf16.mxu0 %v1009_v31  ;;  %3248 = vmatprep.subr.bf16.mxu1 %v1009_v31 }
 0x1f0   : > { %3106 = vmatpush3.bf16.msra.mxu0 %v1009_v31  ;;  %3256 = vmatpush3.bf16.msra.mxu1 %v1009_v31  ;;  %v3358_v31 = vld [vmem:[%s4737_s5 + $0x170] sm:$0xff]  }
 0x1f1   : > { %3107 = vmatprep.subr.bf16.mxu0 %v1008_v36  ;;  %3249 = vmatprep.subr.bf16.mxu1 %v1008_v36 }
 0x1f4   : > { %3108 = vmatpush3.bf16.msra.mxu0 %v1008_v36  ;;  %3257 = vmatpush3.bf16.msra.mxu1 %v1008_v36  ;;  %v3363_v36 = vld [vmem:[%s4737_s5 + $0x188] sm:$0xff]  }
 0x1f5   : > { %3109 = vmatprep.subr.bf16.mxu0 %v1007_v46  ;;  %3250 = vmatprep.subr.bf16.mxu1 %v1007_v46 }
 0x1f8   : > { %3110 = vmatpush3.bf16.msra.mxu0 %v1007_v46  ;;  %3258 = vmatpush3.bf16.msra.mxu1 %v1007_v46  ;;  %v3369_v46 = vld [vmem:[%s4737_s5 + $0xb8] sm:$0xff]  }
 0x1f9   : > { %3111 = vmatprep.subr.bf16.mxu0 %v1006_v1  ;;  %3251 = vmatprep.subr.bf16.mxu1 %v1006_v1 }
 0x1fc   : > { %3112 = vmatpush3.bf16.msra.mxu0 %v1006_v1  ;;  %3259 = vmatpush3.bf16.msra.mxu1 %v1006_v1  ;;  %v3375_v1 = vld [vmem:[%s4737_s5 + $0x1b8] sm:$0xff]  }
 0x1fd   : > { %3113 = vmatprep.subr.bf16.mxu0 %v1005_v57  ;;  %3252 = vmatprep.subr.bf16.mxu1 %v1005_v57 }
 0x200   : > { %3114 = vmatpush3.bf16.msra.mxu0 %v1005_v57  ;;  %3260 = vmatpush3.bf16.msra.mxu1 %v1005_v57  ;;  %v3383_v57 = vld [vmem:[%s4737_s5 + $0x1d8] sm:$0xff]  }
 0x201   : > { %3115 = vmatprep.subr.bf16.mxu0 %v1004_v58  ;;  %3253 = vmatprep.subr.bf16.mxu1 %v1004_v58 }
 0x204   : > { %3116 = vmatpush3.bf16.msra.mxu0 %v1004_v58  ;;  %3261 = vmatpush3.bf16.msra.mxu1 %v1004_v58  ;;  %v3386_v58 = vld [vmem:[%s4737_s5 + $0x1f0] sm:$0xff]  }
 0x205   : > { %3117 = vmatprep.subr.bf16.mxu0 %v1003_v60  ;;  %3254 = vmatprep.subr.bf16.mxu1 %v1003_v60 }
 0x208   : > { %3118 = vmatpush3.bf16.msra.mxu0 %v1003_v60  ;;  %3262 = vmatpush3.bf16.msra.mxu1 %v1003_v60 }
 0x20b   : > { %3120 = vmatmul.mubr.bf16.vlgmr.msra.gmra.mxu0 %v3325_v56  ;;  %3180 = vmatmul.mubr.bf16.vlgmr.msra.gmra.mxu1 %v3327_v54 }
 0x20c   : > { %3123 = vmatprep.mubr.bf16.mxu0 %v3328_v61  ;;  %3183 = vmatprep.mubr.bf16.mxu1 %v3330_v62 }
 0x213   : > { %3124 = vmatmul.mubr.bf16.gmra.mxu0 %v3329_v63  ;;  %3184 = vmatmul.mubr.bf16.gmra.mxu1 %v3331_v0 }
 0x214   : > { %3127 = vmatprep.mubr.bf16.mxu0 %v3332_v2  ;;  %3187 = vmatprep.mubr.bf16.mxu1 %v3334_v3 }
 0x21b   : > { %3128 = vmatmul.mubr.bf16.gmra.mxu0 %v3333_v4  ;;  %3188 = vmatmul.mubr.bf16.gmra.mxu1 %v3335_v5 }
 0x21c   : > { %3131 = vmatprep.mubr.bf16.mxu0 %v3336_v7  ;;  %3191 = vmatprep.mubr.bf16.mxu1 %v3338_v9 }
 0x223   : > { %3132 = vmatmul.mubr.bf16.gmra.mxu0 %v3337_v10  ;;  %3192 = vmatmul.mubr.bf16.gmra.mxu1 %v3339_v11 }
 0x224   : > { %3135 = vmatprep.mubr.bf16.mxu0 %v3340_v12  ;;  %3195 = vmatprep.mubr.bf16.mxu1 %v3342_v13 }
 0x22b   : > { %3136 = vmatmul.mubr.bf16.gmra.mxu0 %v3341_v14  ;;  %3196 = vmatmul.mubr.bf16.gmra.mxu1 %v3343_v15 }
 0x22c   : > { %3139 = vmatprep.mubr.bf16.mxu0 %v3344_v32  ;;  %3199 = vmatprep.mubr.bf16.mxu1 %v3346_v16 }
 0x233   : > { %3140 = vmatmul.mubr.bf16.gmra.mxu0 %v3345_v17  ;;  %3200 = vmatmul.mubr.bf16.gmra.mxu1 %v3347_v18 }
 0x234   : > { %3143 = vmatprep.mubr.bf16.mxu0 %v3348_v8  ;;  %3203 = vmatprep.mubr.bf16.mxu1 %v3350_v19 }
 0x23b   : > { %3144 = vmatmul.mubr.bf16.gmra.mxu0 %v3349_v20  ;;  %3204 = vmatmul.mubr.bf16.gmra.mxu1 %v3351_v21 }
 0x23c   : > { %3147 = vmatprep.mubr.bf16.mxu0 %v3352_v23  ;;  %3207 = vmatprep.mubr.bf16.mxu1 %v3354_v24 }
 0x243   : > { %3148 = vmatmul.mubr.bf16.gmra.mxu0 %v3353_v25  ;;  %3208 = vmatmul.mubr.bf16.gmra.mxu1 %v3355_v26 }
 0x244   : > { %3151 = vmatprep.mubr.bf16.mxu0 %v3356_v30  ;;  %3211 = vmatprep.mubr.bf16.mxu1 %v3358_v31 }
 0x24b   : > { %3152 = vmatmul.mubr.bf16.gmra.mxu0 %v3357_v33  ;;  %3212 = vmatmul.mubr.bf16.gmra.mxu1 %v3359_v34 }
 0x24c   : > { %3155 = vmatprep.mubr.bf16.mxu0 %v3360_v35  ;;  %3215 = vmatprep.mubr.bf16.mxu1 %v3362_v6 }
 0x253   : > { %3156 = vmatmul.mubr.bf16.gmra.mxu0 %v3361_v43  ;;  %3216 = vmatmul.mubr.bf16.gmra.mxu1 %v3363_v36 }
 0x254   : > { %3159 = vmatprep.mubr.bf16.mxu0 %v3364_v38  ;;  %3219 = vmatprep.mubr.bf16.mxu1 %v3366_v39 }
 0x25b   : > { %3160 = vmatmul.mubr.bf16.gmra.mxu0 %v3365_v40  ;;  %3220 = vmatmul.mubr.bf16.gmra.mxu1 %v3367_v41 }
 0x25c   : > { %3163 = vmatprep.mubr.bf16.mxu0 %v3368_v44  ;;  %3223 = vmatprep.mubr.bf16.mxu1 %v3370_v37 }
 0x263   : > { %3164 = vmatmul.mubr.bf16.gmra.mxu0 %v3369_v46  ;;  %3224 = vmatmul.mubr.bf16.gmra.mxu1 %v3371_v53 }
 0x264   : > { %3167 = vmatprep.mubr.bf16.mxu0 %v3372_v45  ;;  %3227 = vmatprep.mubr.bf16.mxu1 %v3374_v47 }
 0x26b   : > { %3168 = vmatmul.mubr.bf16.gmra.mxu0 %v3373_v59  ;;  %3228 = vmatmul.mubr.bf16.gmra.mxu1 %v3375_v1 }
 0x26c   : > { %3171 = vmatprep.mubr.bf16.mxu0 %v3376_v28  ;;  %3231 = vmatprep.mubr.bf16.mxu1 %v3378_v49 }
 0x273   : > { %3172 = vmatmul.mubr.bf16.gmra.mxu0 %v3377_v50  ;;  %3232 = vmatmul.mubr.bf16.gmra.mxu1 %v3379_v51 }
 0x274   : > { %3175 = vmatprep.mubr.bf16.mxu0 %v3380_v27  ;;  %3235 = vmatprep.mubr.bf16.mxu1 %v3382_v52 }
 0x27b   : > { %3176 = vmatmul.mubr.bf16.gmra.mxu0 %v3381_v22  ;;  %3236 = vmatmul.mubr.bf16.gmra.mxu1 %v3383_v57 }
 0x27c   : > { %3239 = vmatprep.mubr.bf16.mxu1 %v3384_v48 }
 0x283   : > { %3240 = vmatmul.mubr.bf16.gmra.mxu1 %v3385_v55 }
 0x284   : > { %3243 = vmatprep.mubr.bf16.mxu1 %v3386_v58 }
 0x28b   : > { %3244 = vmatmul.mubr.bf16.gmra.mxu1 %v3387_v42 }
 0x2cb   : > { %v3121_v29 = vpop.f32.mrf.mxu0  ;;  %v3181_v60 = vpop.f32.mrf.mxu1 }
 0x2cc   : > { %v1947_v56 = vsel %vm1940_vm1, %v3121_v29, -inf  ;;  %v2127_v62 = vsel %vm1940_vm1, %v3181_v60, -inf }
 0x2cd   : > { %1948 = vmax.xlane.f32.xlu0 %v1947_v56  ;;  %v1429_v54 = vpop.f32.mrf.mxu0  ;;  %v1669_v63 = vpop.f32.mrf.mxu1 }
 0x2ce   : > { %v1941_v61 = vsel %vm1940_vm1, %v1429_v54, -inf  ;;  %v2121_v5 = vsel %vm1940_vm1, %v1669_v63, -inf }
 0x2cf   : > { %1942 = vmax.xlane.f32.xlu1 %v1941_v61  ;;  %v3122_v0 = vpop.f32.mrf.mxu0  ;;  %v3182_v4 = vpop.f32.mrf.mxu1 }
 0x2d0   : > { %v1950_v3 = vsel %vm1940_vm1, %v3122_v0, -inf  ;;  %v2130_v9 = vsel %vm1940_vm1, %v3182_v4, -inf }
 0x2d1   : > { %2128 = vmax.xlane.f32.xlu0 %v2127_v62  ;;  %v1432_v2 = vpop.f32.mrf.mxu0  ;;  %v1672_v10 = vpop.f32.mrf.mxu1 }
 0x2d2   : > { %v1944_v11 = vsel %vm1940_vm1, %v1432_v2, -inf  ;;  %v2124_v14 = vsel %vm1940_vm1, %v1672_v10, -inf }
 0x2d3   : > { %1951 = vmax.xlane.f32.xlu1 %v1950_v3  ;;  %v3125_v7 = vpop.f32.mrf.mxu0  ;;  %v3185_v13 = vpop.f32.mrf.mxu1 }
 0x2d4   : > { %v1959_v15 = vsel %vm1940_vm1, %v3125_v7, -inf  ;;  %v2139_v18 = vsel %vm1940_vm1, %v3185_v13, -inf }
 0x2d5   : > { %2122 = vmax.xlane.f32.xlu0 %v2121_v5  ;;  %v1445_v12 = vpop.f32.mrf.mxu0  ;;  %v1685_v16 = vpop.f32.mrf.mxu1 }
 0x2d6   : > { %v1953_v21 = vsel %vm1940_vm1, %v1445_v12, -inf  ;;  %v2133_v26 = vsel %vm1940_vm1, %v1685_v16, -inf }
 0x2d7   : > { %2131 = vmax.xlane.f32.xlu1 %v2130_v9  ;;  %v3126_v32 = vpop.f32.mrf.mxu0  ;;  %v3186_v8 = vpop.f32.mrf.mxu1 }
 0x2d8   : > { %v1962_v17 = vsel %vm1940_vm1, %v3126_v32, -inf  ;;  %v2142_v19 = vsel %vm1940_vm1, %v3186_v8, -inf }
 0x2d9   : > { %1945 = vmax.xlane.f32.xlu0 %v1944_v11  ;;  %v1448_v20 = vpop.f32.mrf.mxu0  ;;  %v1688_v25 = vpop.f32.mrf.mxu1 }
 0x2da   : > { %v1956_v24 = vsel %vm1940_vm1, %v1448_v20, -inf  ;;  %v2136_v33 = vsel %vm1940_vm1, %v1688_v25, -inf }
 0x2db   : > { %2125 = vmax.xlane.f32.xlu1 %v2124_v14  ;;  %v3129_v23 = vpop.f32.mrf.mxu0  ;;  %v3189_v31 = vpop.f32.mrf.mxu1 }
 0x2dc   : > { %v1971_v34 = vsel %vm1940_vm1, %v3129_v23, -inf  ;;  %v2151_v36 = vsel %vm1940_vm1, %v3189_v31, -inf }
 0x2dd   : > { %1960 = vmax.xlane.f32.xlu0 %v1959_v15  ;;  %v1461_v30 = vpop.f32.mrf.mxu0  ;;  %v1701_v6 = vpop.f32.mrf.mxu1 }
 0x2de   : > { %v1965_v41 = vsel %vm1940_vm1, %v1461_v30, -inf  ;;  %v2145_v53 = vsel %vm1940_vm1, %v1701_v6, -inf }
 0x2df   : > { %1963 = vmax.xlane.f32.xlu1 %v1962_v17  ;;  %v3130_v35 = vpop.f32.mrf.mxu0  ;;  %v3190_v38 = vpop.f32.mrf.mxu1 }
 0x2e0   : > { %v1974_v43 = vsel %vm1940_vm1, %v3130_v35, -inf  ;;  %v2154_v39 = vsel %vm1940_vm1, %v3190_v38, -inf }
 0x2e1   : > { %2140 = vmax.xlane.f32.xlu0 %v2139_v18  ;;  %v1464_v40 = vpop.f32.mrf.mxu0  ;;  %v1704_v46 = vpop.f32.mrf.mxu1 }
 0x2e2   : > { %v1968_v37 = vsel %vm1940_vm1, %v1464_v40, -inf  ;;  %v2148_v59 = vsel %vm1940_vm1, %v1704_v46, -inf }
 0x2e3   : > { %2143 = vmax.xlane.f32.xlu1 %v2142_v19  ;;  %v3133_v44 = vpop.f32.mrf.mxu0  ;;  %v3193_v47 = vpop.f32.mrf.mxu1 }
 0x2e4   : > { %v1983_v1 = vsel %vm1940_vm1, %v3133_v44, -inf  ;;  %v2163_v51 = vsel %vm1940_vm1, %v3193_v47, -inf }
 0x2e5   : > { %1954 = vmax.xlane.f32.xlu0 %v1953_v21  ;;  %v1477_v45 = vpop.f32.mrf.mxu0  ;;  %v1717_v49 = vpop.f32.mrf.mxu1 }
 0x2e6   : > { %v1977_v57 = vsel %vm1940_vm1, %v1477_v45, -inf  ;;  %v2157_v42 = vsel %vm1940_vm1, %v1717_v49, -inf }
 0x2e7   : > { %1957 = vmax.xlane.f32.xlu1 %v1956_v24  ;;  %v3134_v28 = vpop.f32.mrf.mxu0  ;;  %v3194_v27 = vpop.f32.mrf.mxu1 }
 0x2e8   : > { %v1986_v50 = vsel %vm1940_vm1, %v3134_v28, -inf  ;;  %v2166_v52 = vsel %vm1940_vm1, %v3194_v27, -inf }
 0x2e9   : > { %2134 = vmax.xlane.f32.xlu0 %v2133_v26  ;;  %v1480_v22 = vpop.f32.mrf.mxu0  ;;  %v1720_v58 = vpop.f32.mrf.mxu1 }
 0x2ea   : > { %v1980_v55 = vsel %vm1940_vm1, %v1480_v22, -inf  ;;  %v2160_v56 = vsel %vm1940_vm1, %v1720_v58, -inf }
 0x2eb   : > { %2137 = vmax.xlane.f32.xlu1 %v2136_v33  ;;  %v3137_v48 = vpop.f32.mrf.mxu0  ;;  %v3197_v60 = vpop.f32.mrf.mxu1 }
 0x2ec   : > { %v1995_v54 = vsel %vm1940_vm1, %v3137_v48, -inf  ;;  %v2175_v0 = vsel %vm1940_vm1, %v3197_v60, -inf }
 0x2ed   : > { %1972 = vmax.xlane.f32.xlu0 %v1971_v34  ;;  %v1493_v29 = vpop.f32.mrf.mxu0  ;;  %v1733_v62 = vpop.f32.mrf.mxu1 }
 0x2ee   : > { %v1989_v5 = vsel %vm1940_vm1, %v1493_v29, -inf  ;;  %v2169_v11 = vsel %vm1940_vm1, %v1733_v62, -inf }
 0x2ef   : > { %1975 = vmax.xlane.f32.xlu1 %v1974_v43  ;;  %v3138_v61 = vpop.f32.mrf.mxu0  ;;  %v3198_v2 = vpop.f32.mrf.mxu1 }
 0x2f0   : > { %v1998_v63 = vsel %vm1940_vm1, %v3138_v61, -inf  ;;  %v2178_v3 = vsel %vm1940_vm1, %v3198_v2, -inf }
 0x2f1   : > { %2152 = vmax.xlane.f32.xlu0 %v2151_v36  ;;  %v1496_v4 = vpop.f32.mrf.mxu0  ;;  %v1736_v10 = vpop.f32.mrf.mxu1 }
 0x2f2   : > { %v1992_v9 = vsel %vm1940_vm1, %v1496_v4, -inf  ;;  %v2172_v14 = vsel %vm1940_vm1, %v1736_v10, -inf  ;;  %v2327_v10 = vld [vmem:[%s4738_s6 + $0x10] sm:$0xff] }
 0x2f3   : > { %2155 = vmax.xlane.f32.xlu1 %v2154_v39  ;;  %v3141_v7 = vpop.f32.mrf.mxu0  ;;  %v3201_v13 = vpop.f32.mrf.mxu1 }
 0x2f4   : > { %v2007_v15 = vsel %vm1940_vm1, %v3141_v7, -inf  ;;  %v2187_v18 = vsel %vm1940_vm1, %v3201_v13, -inf }
 0x2f5   : > { %1966 = vmax.xlane.f32.xlu0 %v1965_v41  ;;  %v1509_v12 = vpop.f32.mrf.mxu0  ;;  %v1749_v16 = vpop.f32.mrf.mxu1 }
 0x2f6   : > { %v2001_v21 = vsel %vm1940_vm1, %v1509_v12, -inf  ;;  %v2181_v26 = vsel %vm1940_vm1, %v1749_v16, -inf }
 0x2f7   : > { %1969 = vmax.xlane.f32.xlu1 %v1968_v37  ;;  %v3142_v32 = vpop.f32.mrf.mxu0  ;;  %v3202_v8 = vpop.f32.mrf.mxu1 }
 0x2f8   : > { %v2010_v17 = vsel %vm1940_vm1, %v3142_v32, -inf  ;;  %v2190_v19 = vsel %vm1940_vm1, %v3202_v8, -inf }
 0x2f9   : > { %2146 = vmax.xlane.f32.xlu0 %v2145_v53  ;;  %v1512_v20 = vpop.f32.mrf.mxu0  ;;  %v1752_v25 = vpop.f32.mrf.mxu1 }
 0x2fa   : > { %v2004_v24 = vsel %vm1940_vm1, %v1512_v20, -inf  ;;  %v2184_v33 = vsel %vm1940_vm1, %v1752_v25, -inf }
 0x2fb   : > { %2149 = vmax.xlane.f32.xlu1 %v2148_v59  ;;  %v3145_v23 = vpop.f32.mrf.mxu0  ;;  %v3205_v31 = vpop.f32.mrf.mxu1 }
 0x2fc   : > { %v2019_v34 = vsel %vm1940_vm1, %v3145_v23, -inf  ;;  %v2199_v36 = vsel %vm1940_vm1, %v3205_v31, -inf }
 0x2fd   : > { %1984 = vmax.xlane.f32.xlu0 %v1983_v1  ;;  %v1525_v30 = vpop.f32.mrf.mxu0  ;;  %v1765_v6 = vpop.f32.mrf.mxu1 }
 0x2fe   : > { %v2013_v41 = vsel %vm1940_vm1, %v1525_v30, -inf  ;;  %v2193_v45 = vsel %vm1940_vm1, %v1765_v6, -inf }
 0x2ff   : > { %1987 = vmax.xlane.f32.xlu1 %v1986_v50  ;;  %v3146_v35 = vpop.f32.mrf.mxu0  ;;  %v3206_v38 = vpop.f32.mrf.mxu1 }
 0x300   : > { %v2022_v43 = vsel %vm1940_vm1, %v3146_v35, -inf  ;;  %v2202_v39 = vsel %vm1940_vm1, %v3206_v38, -inf }
 0x301   : > { %2164 = vmax.xlane.f32.xlu0 %v2163_v51  ;;  %v1528_v40 = vpop.f32.mrf.mxu0  ;;  %v1768_v44 = vpop.f32.mrf.mxu1 }
 0x302   : > { %v2016_v46 = vsel %vm1940_vm1, %v1528_v40, -inf  ;;  %v2196_v59 = vsel %vm1940_vm1, %v1768_v44, -inf }
 0x303   : > { %2167 = vmax.xlane.f32.xlu1 %v2166_v52  ;;  %v3149_v37 = vpop.f32.mrf.mxu0  ;;  %v3209_v53 = vpop.f32.mrf.mxu1 }
 0x304   : > { %v2031_v28 = vsel %vm1940_vm1, %v3149_v37, -inf  ;;  %v2211_v27 = vsel %vm1940_vm1, %v3209_v53, -inf  ;;  %v2326_v53 = vld [vmem:[%s4738_s6 + $0x8] sm:$0xff] }
 0x305   : > { %1978 = vmax.xlane.f32.xlu0 %v1977_v57  ;;  %v1541_v47 = vpop.f32.mrf.mxu0  ;;  %v1781_v1 = vpop.f32.mrf.mxu1 }
 0x306   : > { %v2025_v48 = vsel %vm1940_vm1, %v1541_v47, -inf  ;;  %v2205_v29 = vsel %vm1940_vm1, %v1781_v1, -inf }
 0x307   : > { %1981 = vmax.xlane.f32.xlu1 %v1980_v55  ;;  %v3150_v49 = vpop.f32.mrf.mxu0  ;;  %v3210_v51 = vpop.f32.mrf.mxu1 }
 0x308   : > { %v2034_v50 = vsel %vm1940_vm1, %v3150_v49, -inf  ;;  %v2214_v52 = vsel %vm1940_vm1, %v3210_v51, -inf  ;;  %v2386_v49 = vld [vmem:[%s4738_s6 + $0x1e8] sm:$0xff] }
 0x309   : > { %2158 = vmax.xlane.f32.xlu0 %v2157_v42  ;;  %v1544_v22 = vpop.f32.mrf.mxu0  ;;  %v1784_v57 = vpop.f32.mrf.mxu1 }
 0x30a   : > { %v2028_v42 = vsel %vm1940_vm1, %v1544_v22, -inf }
 0x30b   : > { %2161 = vmax.xlane.f32.xlu1 %v2160_v56  ;;  %v3153_v55 = vpop.f32.mrf.mxu0  ;;  %v3213_v58 = vpop.f32.mrf.mxu1 }
 0x30c   : > { %v2043_v61 = vsel %vm1940_vm1, %v3153_v55, -inf  ;;  %v2223_v2 = vsel %vm1940_vm1, %v3213_v58, -inf }
 0x30d   : > { %1996 = vmax.xlane.f32.xlu0 %v1995_v54  ;;  %v1557_v60 = vpop.f32.mrf.mxu0  ;;  %v1797_v56 = vpop.f32.mrf.mxu1  ;;  %v2208_v54 = vsel %vm1940_vm1, %v1784_v57, -inf  ;;  %v2331_v57 = vld [vmem:[%s4738_s6 + $0x30] sm:$0xff] }
 0x30e   : > { %v2217_v16 = vsel %vm1940_vm1, %v1797_v56, -inf  ;;  %v2332_v56 = vld [vmem:[%s4738_s6 + $0x38] sm:$0xff] }
 0x30f   : > { %1999 = vmax.xlane.f32.xlu1 %v1998_v63  ;;  %v3154_v62 = vpop.f32.mrf.mxu0  ;;  %v3214_v63 = vpop.f32.mrf.mxu1 }
 0x310   : > { %v2226_v4 = vsel %vm1940_vm1, %v3214_v63, -inf }
 0x311   : > { %2176 = vmax.xlane.f32.xlu0 %v2175_v0  ;;  %v2046_v0 = vsel %vm1940_vm1, %v3154_v62, -inf }
 0x313   : > { %2179 = vmax.xlane.f32.xlu1 %v2178_v3  ;;  %v1800_v3 = vpop.f32.mrf.mxu1 }
 0x315   : > { %1990 = vmax.xlane.f32.xlu0 %v1989_v5  ;;  %v1560_v5 = vpop.f32.mrf.mxu0  ;;  %v3217_v7 = vpop.f32.mrf.mxu1 }
 0x316   : > { %v2040_v12 = vsel %vm1940_vm1, %v1560_v5, -inf  ;;  %v2235_v37 = vsel %vm1940_vm1, %v3217_v7, -inf }
 0x317   : > { %1993 = vmax.xlane.f32.xlu1 %v1992_v9  ;;  %v2037_v9 = vsel %vm1940_vm1, %v1557_v60, -inf  ;;  %v3978_v32 = vpop.f32.mrf.mxu1 }
 0x318   : > { %v2229_v62 = vsel %vm1940_vm1, %v3978_v32, -inf }
 0x319   : > { %2170 = vmax.xlane.f32.xlu0 %v2169_v11  ;;  %v3157_v11 = vpop.f32.mrf.mxu0  ;;  %v3218_v30 = vpop.f32.mrf.mxu1 }
 0x31a   : > { %v2055_v31 = vsel %vm1940_vm1, %v3157_v11, -inf  ;;  %v2238_v1 = vsel %vm1940_vm1, %v3218_v30, -inf  ;;  %v2389_v30 = vld [vmem:[%s4738_s6 + $0x200] sm:$0xff] }
 0x31b   : > { %2173 = vmax.xlane.f32.xlu1 %v2172_v14  ;;  %v2325_v14 = vld [vmem:[%s4738_s6] sm:$0xff] }
 0x31d   : > { %2008 = vmax.xlane.f32.xlu0 %v2007_v15 }
 0x31f   : > { %2011 = vmax.xlane.f32.xlu1 %v2010_v17 }
 0x321   : > { %2188 = vmax.xlane.f32.xlu0 %v2187_v18  ;;  %v2387_v18 = vld [vmem:[%s4738_s6 + $0x1f0] sm:$0xff] }
 0x323   : > { %2191 = vmax.xlane.f32.xlu1 %v2190_v19  ;;  %v1573_v19 = vpop.f32.mrf.mxu0 }
 0x325   : > { %2002 = vmax.xlane.f32.xlu0 %v2001_v21  ;;  %v2220_v21 = vsel %vm1940_vm1, %v1800_v3, -inf  ;;  %v3158_v35 = vpop.f32.mrf.mxu0 }
 0x327   : > { %2005 = vmax.xlane.f32.xlu1 %v2004_v24  ;;  %v2328_v24 = vld [vmem:[%s4738_s6 + $0x18] sm:$0xff] }
 0x329   : > { %2182 = vmax.xlane.f32.xlu0 %v2181_v26 }
 0x32b   : > { %2185 = vmax.xlane.f32.xlu1 %v2184_v33 }
 0x32d   : > { %2020 = vmax.xlane.f32.xlu0 %v2019_v34  ;;  %v2385_v34 = vld [vmem:[%s4738_s6 + $0x1e0] sm:$0xff] }
 0x32f   : > { %2023 = vmax.xlane.f32.xlu1 %v2022_v43 }
 0x331   : > { %2200 = vmax.xlane.f32.xlu0 %v2199_v36  ;;  %v2058_v36 = vsel %vm1940_vm1, %v3158_v35, -inf }
 0x333   : > { %2203 = vmax.xlane.f32.xlu1 %v2202_v39  ;;  %v2388_v39 = vld [vmem:[%s4738_s6 + $0x1f8] sm:$0xff] }
 0x335   : > { %2014 = vmax.xlane.f32.xlu0 %v2013_v41  ;;  %v1816_v41 = vpop.f32.mrf.mxu1 }
 0x336   : > { %v2232_v7 = vsel %vm1940_vm1, %v1816_v41, -inf }
 0x337   : > { %2017 = vmax.xlane.f32.xlu1 %v2016_v46 }
 0x339   : > { %2194 = vmax.xlane.f32.xlu0 %v2193_v45 }
 0x33b   : > { %2197 = vmax.xlane.f32.xlu1 %v2196_v59  ;;  %v3221_v59 = vpop.f32.mrf.mxu1 }
 0x33d   : > { %2032 = vmax.xlane.f32.xlu0 %v2031_v28 }
 0x33f   : > { %2035 = vmax.xlane.f32.xlu1 %v2034_v50  ;;  %v1576_v50 = vpop.f32.mrf.mxu0 }
 0x341   : > { %2212 = vmax.xlane.f32.xlu0 %v2211_v27  ;;  %v3161_v58 = vpop.f32.mrf.mxu0 }
 0x343   : > { %2215 = vmax.xlane.f32.xlu1 %v2214_v52  ;;  %v2049_v52 = vsel %vm1940_vm1, %v1573_v19, -inf  ;;  %v1589_v3 = vpop.f32.mrf.mxu0 }
 0x345   : > { %2026 = vmax.xlane.f32.xlu0 %v2025_v48  ;;  %v3162_v32 = vpop.f32.mrf.mxu0 }
 0x347   : > { %2029 = vmax.xlane.f32.xlu1 %v2028_v42  ;;  %v4025_v42 = vpop.f32.mrf.mxu1 }
 0x349   : > { %2206 = vmax.xlane.f32.xlu0 %v2205_v29  ;;  %v2052_v29 = vsel %vm1940_vm1, %v1576_v50, -inf  ;;  %v3222_v5 = vpop.f32.mrf.mxu1  ;;  %v2241_v50 = vsel %vm1940_vm1, %v4025_v42, -inf }
 0x34b   : > { %2209 = vmax.xlane.f32.xlu1 %v2208_v54 }
 0x34d   : > { %2044 = vmax.xlane.f32.xlu0 %v2043_v61 }
 0x34f   : > { %2047 = vmax.xlane.f32.xlu1 %v2046_v0  ;;  %v2391_v0 = vld [vmem:[%s4738_s6 + $0x210] sm:$0xff] }
 0x351   : > { %2224 = vmax.xlane.f32.xlu0 %v2223_v2 }
 0x353   : > { %2227 = vmax.xlane.f32.xlu1 %v2226_v4 }
 0x355   : > { %2038 = vmax.xlane.f32.xlu0 %v2037_v9 }
 0x356   : > { %v1949_v13 = vpop.xlane.xlu0 %1948 }
 0x357   : > { %v2455_v15 = vadd.f32 %v2327_v10, %v1949_v13  ;;  %2041 = vmax.xlane.f32.xlu1 %v2040_v12  ;;  %v2392_v10 = vld [vmem:[%s4738_s6 + $0x218] sm:$0xff]  ;;  %v2067_v13 = vsel %vm1940_vm1, %v3161_v58, -inf }
 0x358   : > { %v1943_v17 = vpop.xlane.xlu1 %1942  ;;  %v2396_v58 = vld [vmem:[%s4738_s6 + $0x238] sm:$0xff] }
 0x359   : > { %v2583_v8 = vmax.f32 %v2455_v15, 0.0  ;;  %v2453_v20 = vadd.f32 %v2325_v14, %v1943_v17  ;;  %2218 = vmax.xlane.f32.xlu0 %v2217_v16  ;;  %v2329_v15 = vld [vmem:[%s4738_s6 + $0x20] sm:$0xff] }
 0x35a   : > { %v2129_v23 = vpop.xlane.xlu0 %2128 }
 0x35b   : > { %2712 = vst.msk [vmem:[%s3983_s15 + $0x10] sm:$0xff] %vm2709_vm2, %v2583_v8  ;;  %v2581_v25 = vmax.f32 %v2453_v20, 0.0  ;;  %v2515_v26 = vadd.f32 %v2387_v18, %v2129_v23  ;;  %2221 = vmax.xlane.f32.xlu1 %v2220_v21  ;;  %v1832_v18 = vpop.f32.mrf.mxu1  ;;  %v2070_v8 = vsel %vm1940_vm1, %v3162_v32, -inf  ;;  %v2330_v20 = vld [vmem:[%s4738_s6 + $0x28] sm:$0xff] }
 0x35c   : > { %v1952_v33 = vpop.xlane.xlu1 %1951 }
 0x35d   : > { %2710 = vst.msk [vmem:[%s3983_s15] sm:$0xff] %vm2709_vm2, %v2581_v25  ;;  %v2643_v6 = vmax.f32 %v2515_v26, 0.0  ;;  %v2456_v43 = vadd.f32 %v2328_v24, %v1952_v33  ;;  %2056 = vmax.xlane.f32.xlu0 %v2055_v31  ;;  %v4058_v24 = vpop.f32.mrf.mxu1  ;;  %v2247_v25 = vsel %vm1940_vm1, %v3221_v59, -inf  ;;  %v2336_v59 = vld [vmem:[%s4738_s6 + $0x58] sm:$0xff] }
 0x35e   : > { %v2123_v38 = vpop.xlane.xlu0 %2122 }
 0x35f   : > { %2772 = vst.msk [vmem:[%s3983_s15 + $0x1f0] sm:$0xff] %vm2709_vm2, %v2643_v6  ;;  %v2584_v40 = vmax.f32 %v2456_v43, 0.0  ;;  %v2513_v44 = vadd.f32 %v2385_v34, %v2123_v38  ;;  %2059 = vmax.xlane.f32.xlu1 %v2058_v36  ;;  %v2250_v34 = vsel %vm1940_vm1, %v3222_v5, -inf  ;;  %v2390_v6 = vld [vmem:[%s4738_s6 + $0x208] sm:$0xff]  ;;  %v1592_v43 = vpop.f32.mrf.mxu0 }
 0x360   : > { %v2132_v46 = vpop.xlane.xlu1 %2131  ;;  %v2334_v5 = vld [vmem:[%s4738_s6 + $0x48] sm:$0xff] }
 0x361   : > { %2713 = vst.msk [vmem:[%s3983_s15 + $0x18] sm:$0xff] %vm2709_vm2, %v2584_v40  ;;  %v2641_v45 = vmax.f32 %v2513_v44, 0.0  ;;  %v2516_v47 = vadd.f32 %v2388_v39, %v2132_v46  ;;  %2236 = vmax.xlane.f32.xlu0 %v2235_v37  ;;  %v4072_v39 = vpop.f32.mrf.mxu1  ;;  %v2061_v40 = vsel %vm1940_vm1, %v1589_v3, -inf  ;;  %v2335_v44 = vld [vmem:[%s4738_s6 + $0x50] sm:$0xff] }
 0x362   : > { %v1946_v28 = vpop.xlane.xlu0 %1945 }
 0x363   : > { %2770 = vst.msk [vmem:[%s3983_s15 + $0x1e0] sm:$0xff] %vm2709_vm2, %v2641_v45  ;;  %v2644_v51 = vmax.f32 %v2516_v47, 0.0  ;;  %v2454_v27 = vadd.f32 %v2326_v53, %v1946_v28  ;;  %2239 = vmax.xlane.f32.xlu1 %v2238_v1  ;;  %v3165_v53 = vpop.f32.mrf.mxu0  ;;  %v2064_v45 = vsel %vm1940_vm1, %v1592_v43, -inf  ;;  %v2253_v43 = vsel %vm1940_vm1, %v4072_v39, -inf  ;;  %v2400_v39 = vld [vmem:[%s4738_s6 + $0x258] sm:$0xff] }
 0x364   : > { %v2126_v22 = vpop.xlane.xlu1 %2125 }
 0x365   : > { %2773 = vst.msk [vmem:[%s3983_s15 + $0x1f8] sm:$0xff] %vm2709_vm2, %v2644_v51  ;;  %v2582_v48 = vmax.f32 %v2454_v27, 0.0  ;;  %v2514_v55 = vadd.f32 %v2386_v49, %v2126_v22  ;;  %2050 = vmax.xlane.f32.xlu0 %v2049_v52  ;;  %v3226_v49 = vpop.f32.mrf.mxu1  ;;  %v2395_v27 = vld [vmem:[%s4738_s6 + $0x230] sm:$0xff]  ;;  %v1605_v22 = vpop.f32.mrf.mxu0 }
 0x366   : > { %v1961_v60 = vpop.xlane.xlu0 %1960  ;;  %v2262_v32 = vsel %vm1940_vm1, %v3226_v49, -inf  ;;  %v2337_v49 = vld [vmem:[%s4738_s6 + $0x60] sm:$0xff] }
 0x367   : > { %2711 = vst.msk [vmem:[%s3983_s15 + $0x8] sm:$0xff] %vm2709_vm2, %v2582_v48  ;;  %v2642_v54 = vmax.f32 %v2514_v55, 0.0  ;;  %v2459_v61 = vadd.f32 %v2331_v57, %v1961_v60  ;;  %2053 = vmax.xlane.f32.xlu1 %v2052_v29  ;;  %v2244_v48 = vsel %vm1940_vm1, %v1832_v18, -inf  ;;  %v1848_v60 = vpop.f32.mrf.mxu1 }
 0x368   : > { %v1964_v63 = vpop.xlane.xlu1 %1963 }
 0x369   : > { %2771 = vst.msk [vmem:[%s3983_s15 + $0x1e8] sm:$0xff] %vm2709_vm2, %v2642_v54  ;;  %v2587_v2 = vmax.f32 %v2459_v61, 0.0  ;;  %v2460_v4 = vadd.f32 %v2332_v56, %v1964_v63  ;;  %2230 = vmax.xlane.f32.xlu0 %v2229_v62  ;;  %v2079_v56 = vsel %vm1940_vm1, %v3165_v53, -inf  ;;  %v2333_v61 = vld [vmem:[%s4738_s6 + $0x40] sm:$0xff]  ;;  %v3166_v62 = vpop.f32.mrf.mxu0 }
 0x36a   : > { %v2141_v9 = vpop.xlane.xlu0 %2140  ;;  %v2082_v3 = vsel %vm1940_vm1, %v3166_v62, -inf }
 0x36b   : > { %2716 = vst.msk [vmem:[%s3983_s15 + $0x30] sm:$0xff] %vm2709_vm2, %v2587_v2  ;;  %v2588_v11 = vmax.f32 %v2460_v4, 0.0  ;;  %v2519_v12 = vadd.f32 %v2391_v0, %v2141_v9  ;;  %2233 = vmax.xlane.f32.xlu1 %v2232_v7  ;;  %v4105_v2 = vpop.f32.mrf.mxu1  ;;  %v1608_v18 = vpop.f32.mrf.mxu0 }
 0x36c   : > { %v2144_v14 = vpop.xlane.xlu1 %2143 }
 0x36d   : > { %2717 = vst.msk [vmem:[%s3983_s15 + $0x38] sm:$0xff] %vm2709_vm2, %v2588_v11  ;;  %v2647_v16 = vmax.f32 %v2519_v12, 0.0  ;;  %v2520_v17 = vadd.f32 %v2392_v10, %v2144_v14  ;;  %2068 = vmax.xlane.f32.xlu0 %v2067_v13  ;;  %v2259_v10 = vsel %vm1940_vm1, %v4058_v24, -inf  ;;  %v2393_v12 = vld [vmem:[%s4738_s6 + $0x220] sm:$0xff] }
 0x36e   : > { %v1955_v19 = vpop.xlane.xlu0 %1954 }
 0x36f   : > { %2776 = vst.msk [vmem:[%s3983_s15 + $0x210] sm:$0xff] %vm2709_vm2, %v2647_v16  ;;  %v2648_v21 = vmax.f32 %v2520_v17, 0.0  ;;  %v2457_v23 = vadd.f32 %v2329_v15, %v1955_v19  ;;  %2071 = vmax.xlane.f32.xlu1 %v2070_v8  ;;  %v4120_v15 = vpop.f32.mrf.mxu1  ;;  %v2394_v17 = vld [vmem:[%s4738_s6 + $0x228] sm:$0xff] }
 0x370   : > { %v1958_v26 = vpop.xlane.xlu1 %1957 }
 0x371   : > { %2777 = vst.msk [vmem:[%s3983_s15 + $0x218] sm:$0xff] %vm2709_vm2, %v2648_v21  ;;  %v2585_v31 = vmax.f32 %v2457_v23, 0.0  ;;  %v2458_v33 = vadd.f32 %v2330_v20, %v1958_v26  ;;  %2248 = vmax.xlane.f32.xlu0 %v2247_v25  ;;  %v2073_v20 = vsel %vm1940_vm1, %v1605_v22, -inf  ;;  %v2339_v23 = vld [vmem:[%s4738_s6 + $0x70] sm:$0xff]  ;;  %v3169_v26 = vpop.f32.mrf.mxu0 }
 0x372   : > { %v2135_v35 = vpop.xlane.xlu0 %2134 }
 0x373   : > { %2714 = vst.msk [vmem:[%s3983_s15 + $0x20] sm:$0xff] %vm2709_vm2, %v2585_v31  ;;  %v2586_v36 = vmax.f32 %v2458_v33, 0.0  ;;  %v2517_v38 = vadd.f32 %v2389_v30, %v2135_v35  ;;  %2251 = vmax.xlane.f32.xlu1 %v2250_v34  ;;  %v3230_v30 = vpop.f32.mrf.mxu1  ;;  %v2076_v31 = vsel %vm1940_vm1, %v1608_v18, -inf  ;;  %v2340_v34 = vld [vmem:[%s4738_s6 + $0x78] sm:$0xff] }
 0x374   : > { %v2138_v41 = vpop.xlane.xlu1 %2137 }
 0x375   : > { %2715 = vst.msk [vmem:[%s3983_s15 + $0x28] sm:$0xff] %vm2709_vm2, %v2586_v36  ;;  %v2645_v37 = vmax.f32 %v2517_v38, 0.0  ;;  %v2518_v46 = vadd.f32 %v2390_v6, %v2138_v41  ;;  %2062 = vmax.xlane.f32.xlu0 %v2061_v40  ;;  %v2399_v38 = vld [vmem:[%s4738_s6 + $0x250] sm:$0xff]  ;;  %v1621_v41 = vpop.f32.mrf.mxu0 }
 0x376   : > { %v1973_v47 = vpop.xlane.xlu0 %1972 }
 0x377   : > { %2774 = vst.msk [vmem:[%s3983_s15 + $0x200] sm:$0xff] %vm2709_vm2, %v2645_v37  ;;  %v2646_v1 = vmax.f32 %v2518_v46, 0.0  ;;  %v2463_v28 = vadd.f32 %v2335_v44, %v1973_v47  ;;  %2065 = vmax.xlane.f32.xlu1 %v2064_v45  ;;  %v4147_v37 = vpop.f32.mrf.mxu1  ;;  %v2256_v46 = vsel %vm1940_vm1, %v1848_v60, -inf  ;;  %v2397_v60 = vld [vmem:[%s4738_s6 + $0x240] sm:$0xff] }
 0x378   : > { %v1976_v51 = vpop.xlane.xlu1 %1975 }
 0x379   : > { %2775 = vst.msk [vmem:[%s3983_s15 + $0x208] sm:$0xff] %vm2709_vm2, %v2646_v1  ;;  %v2591_v52 = vmax.f32 %v2463_v28, 0.0  ;;  %v2464_v57 = vadd.f32 %v2336_v59, %v1976_v51  ;;  %2242 = vmax.xlane.f32.xlu0 %v2241_v50  ;;  %v4155_v59 = vpop.f32.mrf.mxu1  ;;  %v2091_v1 = vsel %vm1940_vm1, %v3169_v26, -inf  ;;  %v3170_v50 = vpop.f32.mrf.mxu0  ;;  %v2268_v26 = vsel %vm1940_vm1, %v4147_v37, -inf  ;;  %v2342_v37 = vld [vmem:[%s4738_s6 + $0x88] sm:$0xff] }
 0x37a   : > { %v2153_v55 = vpop.xlane.xlu0 %2152 }
 0x37b   : > { %2720 = vst.msk [vmem:[%s3983_s15 + $0x50] sm:$0xff] %vm2709_vm2, %v2591_v52  ;;  %v2592_v42 = vmax.f32 %v2464_v57, 0.0  ;;  %v2523_v29 = vadd.f32 %v2395_v27, %v2153_v55  ;;  %2245 = vmax.xlane.f32.xlu1 %v2244_v48  ;;  %v2094_v52 = vsel %vm1940_vm1, %v3170_v50, -inf  ;;  %v2338_v57 = vld [vmem:[%s4738_s6 + $0x68] sm:$0xff] }
 0x37c   : > { %v2156_v54 = vpop.xlane.xlu1 %2155 }
 0x37d   : > { %2721 = vst.msk [vmem:[%s3983_s15 + $0x58] sm:$0xff] %vm2709_vm2, %v2592_v42  ;;  %v2651_v63 = vmax.f32 %v2523_v29, 0.0  ;;  %v2524_v0 = vadd.f32 %v2396_v58, %v2156_v54  ;;  %2080 = vmax.xlane.f32.xlu0 %v2079_v56  ;;  %v4169_v58 = vpop.f32.mrf.mxu1  ;;  %v2271_v42 = vsel %vm1940_vm1, %v4105_v2, -inf }
 0x37e   : > { %v1967_v4 = vpop.xlane.xlu0 %1966 }
 0x37f   : > { %2780 = vst.msk [vmem:[%s3983_s15 + $0x230] sm:$0xff] %vm2709_vm2, %v2651_v63  ;;  %v2652_v7 = vmax.f32 %v2524_v0, 0.0  ;;  %v2461_v9 = vadd.f32 %v2333_v61, %v1967_v4  ;;  %2083 = vmax.xlane.f32.xlu1 %v2082_v3  ;;  %v2274_v61 = vsel %vm1940_vm1, %v3230_v30, -inf  ;;  %v2398_v63 = vld [vmem:[%s4738_s6 + $0x248] sm:$0xff]  ;;  %v1624_v0 = vpop.f32.mrf.mxu0  ;;  %v3234_v4 = vpop.f32.mrf.mxu1 }
 0x380   : > { %v1970_v11 = vpop.xlane.xlu1 %1969  ;;  %v2286_v50 = vsel %vm1940_vm1, %v3234_v4, -inf }
 0x381   : > { %2781 = vst.msk [vmem:[%s3983_s15 + $0x238] sm:$0xff] %vm2709_vm2, %v2652_v7  ;;  %v2589_v13 = vmax.f32 %v2461_v9, 0.0  ;;  %v2462_v14 = vadd.f32 %v2334_v5, %v1970_v11  ;;  %2260 = vmax.xlane.f32.xlu0 %v2259_v10  ;;  %v2085_v5 = vsel %vm1940_vm1, %v1621_v41, -inf  ;;  %v2343_v9 = vld [vmem:[%s4738_s6 + $0x90] sm:$0xff]  ;;  %v4196_v18 = vpop.f32.mrf.mxu1 }
 0x382   : > { %v2147_v16 = vpop.xlane.xlu0 %2146 }
 0x383   : > { %2718 = vst.msk [vmem:[%s3983_s15 + $0x40] sm:$0xff] %vm2709_vm2, %v2589_v13  ;;  %v2590_v8 = vmax.f32 %v2462_v14, 0.0  ;;  %v2521_v19 = vadd.f32 %v2393_v12, %v2147_v16  ;;  %2263 = vmax.xlane.f32.xlu1 %v2262_v32  ;;  %v3173_v12 = vpop.f32.mrf.mxu0  ;;  %v2088_v13 = vsel %vm1940_vm1, %v1624_v0, -inf  ;;  %v2344_v32 = vld [vmem:[%s4738_s6 + $0x98] sm:$0xff] }
 0x384   : > { %v2150_v21 = vpop.xlane.xlu1 %2149 }
 0x385   : > { %2719 = vst.msk [vmem:[%s3983_s15 + $0x48] sm:$0xff] %vm2709_vm2, %v2590_v8  ;;  %v2649_v24 = vmax.f32 %v2521_v19, 0.0  ;;  %v2522_v25 = vadd.f32 %v2394_v17, %v2150_v21  ;;  %2074 = vmax.xlane.f32.xlu0 %v2073_v20  ;;  %v2265_v8 = vsel %vm1940_vm1, %v4120_v15, -inf  ;;  %v2403_v20 = vld [vmem:[%s4738_s6 + $0x270] sm:$0xff]  ;;  %v2404_v15 = vld [vmem:[%s4738_s6 + $0x278] sm:$0xff] }
 0x386   : > { %v1985_v33 = vpop.xlane.xlu0 %1984 }
 0x387   : > { %2778 = vst.msk [vmem:[%s3983_s15 + $0x220] sm:$0xff] %vm2709_vm2, %v2649_v24  ;;  %v2650_v35 = vmax.f32 %v2522_v25, 0.0  ;;  %v2467_v6 = vadd.f32 %v2339_v23, %v1985_v33  ;;  %2077 = vmax.xlane.f32.xlu1 %v2076_v31  ;;  %v1637_v23 = vpop.f32.mrf.mxu0  ;;  %v4205_v25 = vpop.f32.mrf.mxu1 }
 0x388   : > { %v1988_v36 = vpop.xlane.xlu1 %1987 }
 0x389   : > { %2779 = vst.msk [vmem:[%s3983_s15 + $0x228] sm:$0xff] %vm2709_vm2, %v2650_v35  ;;  %v2595_v40 = vmax.f32 %v2467_v6, 0.0  ;;  %v2468_v44 = vadd.f32 %v2340_v34, %v1988_v36  ;;  %2254 = vmax.xlane.f32.xlu0 %v2253_v43  ;;  %v2103_v34 = vsel %vm1940_vm1, %v3173_v12, -inf  ;;  %v2341_v6 = vld [vmem:[%s4738_s6 + $0x80] sm:$0xff]  ;;  %v3174_v43 = vpop.f32.mrf.mxu0 }
 0x38a   : > { %v2165_v53 = vpop.xlane.xlu0 %2164  ;;  %v2106_v41 = vsel %vm1940_vm1, %v3174_v43, -inf }
 0x38b   : > { %2724 = vst.msk [vmem:[%s3983_s15 + $0x70] sm:$0xff] %vm2709_vm2, %v2595_v40  ;;  %v2596_v45 = vmax.f32 %v2468_v44, 0.0  ;;  %v2527_v47 = vadd.f32 %v2399_v38, %v2165_v53  ;;  %2257 = vmax.xlane.f32.xlu1 %v2256_v46  ;;  %v4220_v40 = vpop.f32.mrf.mxu1 }
 0x38c   : > { %v2168_v28 = vpop.xlane.xlu1 %2167 }
 0x38d   : > { %2725 = vst.msk [vmem:[%s3983_s15 + $0x78] sm:$0xff] %vm2709_vm2, %v2596_v45  ;;  %v2655_v51 = vmax.f32 %v2527_v47, 0.0  ;;  %v2528_v27 = vadd.f32 %v2400_v39, %v2168_v28  ;;  %2092 = vmax.xlane.f32.xlu0 %v2091_v1  ;;  %v2283_v39 = vsel %vm1940_vm1, %v4155_v59, -inf  ;;  %v2401_v47 = vld [vmem:[%s4738_s6 + $0x260] sm:$0xff]  ;;  %v2402_v59 = vld [vmem:[%s4738_s6 + $0x268] sm:$0xff] }
 0x38e   : > { %v1979_v22 = vpop.xlane.xlu0 %1978 }
 0x38f   : > { %2784 = vst.msk [vmem:[%s3983_s15 + $0x250] sm:$0xff] %vm2709_vm2, %v2655_v51  ;;  %v2656_v48 = vmax.f32 %v2528_v27, 0.0  ;;  %v2465_v55 = vadd.f32 %v2337_v49, %v1979_v22  ;;  %2095 = vmax.xlane.f32.xlu1 %v2094_v52  ;;  %v4235_v49 = vpop.f32.mrf.mxu1  ;;  %v1640_v27 = vpop.f32.mrf.mxu0 }
 0x390   : > { %v1982_v29 = vpop.xlane.xlu1 %1981  ;;  %v2298_v43 = vsel %vm1940_vm1, %v4235_v49, -inf  ;;  %v2352_v49 = vld [vmem:[%s4738_s6 + $0xd8] sm:$0xff] }
 0x391   : > { %2785 = vst.msk [vmem:[%s3983_s15 + $0x258] sm:$0xff] %vm2709_vm2, %v2656_v48  ;;  %v2593_v56 = vmax.f32 %v2465_v55, 0.0  ;;  %v2466_v54 = vadd.f32 %v2338_v57, %v1982_v29  ;;  %2272 = vmax.xlane.f32.xlu0 %v2271_v42  ;;  %v2097_v57 = vsel %vm1940_vm1, %v1637_v23, -inf  ;;  %v2347_v55 = vld [vmem:[%s4738_s6 + $0xb0] sm:$0xff] }
 0x392   : > { %v2159_v62 = vpop.xlane.xlu0 %2158 }
 0x393   : > { %2722 = vst.msk [vmem:[%s3983_s15 + $0x60] sm:$0xff] %vm2709_vm2, %v2593_v56  ;;  %v2594_v2 = vmax.f32 %v2466_v54, 0.0  ;;  %v2525_v3 = vadd.f32 %v2397_v60, %v2159_v62  ;;  %2275 = vmax.xlane.f32.xlu1 %v2274_v61  ;;  %v3177_v60 = vpop.f32.mrf.mxu0  ;;  %v4249_v56 = vpop.f32.mrf.mxu1  ;;  %v2100_v54 = vsel %vm1940_vm1, %v1640_v27, -inf  ;;  %v2348_v62 = vld [vmem:[%s4738_s6 + $0xb8] sm:$0xff]  ;;  %v2289_v27 = vsel %vm1940_vm1, %v4220_v40, -inf }
 0x394   : > { %v2162_v7 = vpop.xlane.xlu1 %2161 }
 0x395   : > { %2723 = vst.msk [vmem:[%s3983_s15 + $0x68] sm:$0xff] %vm2709_vm2, %v2594_v2  ;;  %v2653_v10 = vmax.f32 %v2525_v3, 0.0  ;;  %v2526_v11 = vadd.f32 %v2398_v63, %v2162_v7  ;;  %2086 = vmax.xlane.f32.xlu0 %v2085_v5  ;;  %v4257_v2 = vpop.f32.mrf.mxu1  ;;  %v2277_v3 = vsel %vm1940_vm1, %v4169_v58, -inf  ;;  %v2407_v5 = vld [vmem:[%s4738_s6 + $0x290] sm:$0xff]  ;;  %v2408_v58 = vld [vmem:[%s4738_s6 + $0x298] sm:$0xff] }
 0x396   : > { %v1997_v14 = vpop.xlane.xlu0 %1996 }
 0x397   : > { %2782 = vst.msk [vmem:[%s3983_s15 + $0x240] sm:$0xff] %vm2709_vm2, %v2653_v10  ;;  %v2654_v16 = vmax.f32 %v2526_v11, 0.0  ;;  %v2471_v17 = vadd.f32 %v2343_v9, %v1997_v14  ;;  %2089 = vmax.xlane.f32.xlu1 %v2088_v13  ;;  %v1653_v9 = vpop.f32.mrf.mxu0  ;;  %v2280_v11 = vsel %vm1940_vm1, %v4196_v18, -inf  ;;  %v2345_v18 = vld [vmem:[%s4738_s6 + $0xa0] sm:$0xff] }
 0x398   : > { %v2000_v19 = vpop.xlane.xlu1 %1999 }
 0x399   : > { %2783 = vst.msk [vmem:[%s3983_s15 + $0x248] sm:$0xff] %vm2709_vm2, %v2654_v16  ;;  %v2599_v21 = vmax.f32 %v2471_v17, 0.0  ;;  %v2472_v24 = vadd.f32 %v2344_v32, %v2000_v19  ;;  %2266 = vmax.xlane.f32.xlu0 %v2265_v8  ;;  %v4273_v32 = vpop.f32.mrf.mxu1  ;;  %v2115_v16 = vsel %vm1940_vm1, %v3177_v60, -inf  ;;  %v3178_v8 = vpop.f32.mrf.mxu0 }
 0x39a   : > { %v2177_v30 = vpop.xlane.xlu0 %2176 }
 0x39b   : > { %2728 = vst.msk [vmem:[%s3983_s15 + $0x90] sm:$0xff] %vm2709_vm2, %v2599_v21  ;;  %v2600_v31 = vmax.f32 %v2472_v24, 0.0  ;;  %v2531_v33 = vadd.f32 %v2403_v20, %v2177_v30  ;;  %2269 = vmax.xlane.f32.xlu1 %v2268_v26  ;;  %v2118_v21 = vsel %vm1940_vm1, %v3178_v8, -inf  ;;  %v2346_v24 = vld [vmem:[%s4738_s6 + $0xa8] sm:$0xff] }
 0x39c   : > { %v2180_v35 = vpop.xlane.xlu1 %2179 }
 0x39d   : > { %2729 = vst.msk [vmem:[%s3983_s15 + $0x98] sm:$0xff] %vm2709_vm2, %v2600_v31  ;;  %v2659_v36 = vmax.f32 %v2531_v33, 0.0  ;;  %v2532_v38 = vadd.f32 %v2404_v15, %v2180_v35  ;;  %2104 = vmax.xlane.f32.xlu0 %v2103_v34  ;;  %v3242_v15 = vpop.f32.mrf.mxu1  ;;  %v2295_v31 = vsel %vm1940_vm1, %v4205_v25, -inf  ;;  %v2405_v34 = vld [vmem:[%s4738_s6 + $0x280] sm:$0xff]  ;;  %v1656_v25 = vpop.f32.mrf.mxu0 }
 0x39e   : > { %v1991_v44 = vpop.xlane.xlu0 %1990 }
 0x39f   : > { %2788 = vst.msk [vmem:[%s3983_s15 + $0x270] sm:$0xff] %vm2709_vm2, %v2659_v36  ;;  %v2660_v46 = vmax.f32 %v2532_v38, 0.0  ;;  %v2469_v53 = vadd.f32 %v2341_v6, %v1991_v44  ;;  %2107 = vmax.xlane.f32.xlu1 %v2106_v41  ;;  %v2406_v38 = vld [vmem:[%s4738_s6 + $0x288] sm:$0xff] }
 0x3a0   : > { %v1994_v45 = vpop.xlane.xlu1 %1993 }
 0x3a1   : > { %2789 = vst.msk [vmem:[%s3983_s15 + $0x278] sm:$0xff] %vm2709_vm2, %v2660_v46  ;;  %v2597_v1 = vmax.f32 %v2469_v53, 0.0  ;;  %v2470_v28 = vadd.f32 %v2342_v37, %v1994_v45  ;;  %2284 = vmax.xlane.f32.xlu0 %v2283_v39  ;;  %v1912_v37 = vpop.f32.mrf.mxu1  ;;  %v2109_v46 = vsel %vm1940_vm1, %v1653_v9, -inf  ;;  %v2351_v39 = vld [vmem:[%s4738_s6 + $0xd0] sm:$0xff] }
 0x3a2   : > { %v2171_v51 = vpop.xlane.xlu0 %2170 }
 0x3a3   : > { %2726 = vst.msk [vmem:[%s3983_s15 + $0x80] sm:$0xff] %vm2709_vm2, %v2597_v1  ;;  %v2598_v52 = vmax.f32 %v2470_v28, 0.0  ;;  %v2529_v22 = vadd.f32 %v2401_v47, %v2171_v51  ;;  %2287 = vmax.xlane.f32.xlu1 %v2286_v50  ;;  %v2112_v1 = vsel %vm1940_vm1, %v1656_v25, -inf }
 0x3a4   : > { %v2174_v48 = vpop.xlane.xlu1 %2173 }
 0x3a5   : > { %2727 = vst.msk [vmem:[%s3983_s15 + $0x88] sm:$0xff] %vm2709_vm2, %v2598_v52  ;;  %v2657_v42 = vmax.f32 %v2529_v22, 0.0  ;;  %v2530_v29 = vadd.f32 %v2402_v59, %v2174_v48  ;;  %2098 = vmax.xlane.f32.xlu0 %v2097_v57  ;;  %v3245_v59 = vpop.f32.mrf.mxu1  ;;  %v2411_v22 = vld [vmem:[%s4738_s6 + $0x2b0] sm:$0xff] }
 0x3a6   : > { %v2009_v61 = vpop.xlane.xlu0 %2008 }
 0x3a7   : > { %2786 = vst.msk [vmem:[%s3983_s15 + $0x260] sm:$0xff] %vm2709_vm2, %v2657_v42  ;;  %v2658_v63 = vmax.f32 %v2530_v29, 0.0  ;;  %v2475_v0 = vadd.f32 %v2347_v55, %v2009_v61  ;;  %2101 = vmax.xlane.f32.xlu1 %v2100_v54  ;;  %v2292_v55 = vsel %vm1940_vm1, %v4249_v56, -inf  ;;  %v2412_v29 = vld [vmem:[%s4738_s6 + $0x2b8] sm:$0xff]  ;;  %v1925_v54 = vpop.f32.mrf.mxu1  ;;  %v2307_v61 = vsel %vm1940_vm1, %v4257_v2, -inf  ;;  %v2349_v56 = vld [vmem:[%s4738_s6 + $0xc0] sm:$0xff] }
 0x3a8   : > { %v2012_v4 = vpop.xlane.xlu1 %2011 }
 0x3a9   : > { %2787 = vst.msk [vmem:[%s3983_s15 + $0x268] sm:$0xff] %vm2709_vm2, %v2658_v63  ;;  %v2603_v7 = vmax.f32 %v2475_v0, 0.0  ;;  %v2476_v10 = vadd.f32 %v2348_v62, %v2012_v4  ;;  %2278 = vmax.xlane.f32.xlu0 %v2277_v3  ;;  %v2310_v3 = vsel %vm1940_vm1, %v3242_v15, -inf  ;;  %v2356_v15 = vld [vmem:[%s4738_s6 + $0xf8] sm:$0xff] }
 0x3aa   : > { %v2189_v12 = vpop.xlane.xlu0 %2188 }
 0x3ab   : > { %2732 = vst.msk [vmem:[%s3983_s15 + $0xb0] sm:$0xff] %vm2709_vm2, %v2603_v7  ;;  %v2604_v13 = vmax.f32 %v2476_v10, 0.0  ;;  %v2535_v14 = vadd.f32 %v2407_v5, %v2189_v12  ;;  %2281 = vmax.xlane.f32.xlu1 %v2280_v11  ;;  %v2350_v5 = vld [vmem:[%s4738_s6 + $0xc8] sm:$0xff]  ;;  %v3246_v7 = vpop.f32.mrf.mxu1  ;;  %v2301_v10 = vsel %vm1940_vm1, %v4273_v32, -inf  ;;  %v2409_v12 = vld [vmem:[%s4738_s6 + $0x2a0] sm:$0xff] }
 0x3ac   : > { %v2192_v17 = vpop.xlane.xlu1 %2191 }
 0x3ad   : > { %2733 = vst.msk [vmem:[%s3983_s15 + $0xb8] sm:$0xff] %vm2709_vm2, %v2604_v13  ;;  %v2663_v19 = vmax.f32 %v2535_v14, 0.0  ;;  %v2536_v20 = vadd.f32 %v2408_v58, %v2192_v17  ;;  %2116 = vmax.xlane.f32.xlu0 %v2115_v16  ;;  %v2304_v14 = vsel %vm1940_vm1, %v1912_v37, -inf  ;;  %v2410_v17 = vld [vmem:[%s4738_s6 + $0x2a8] sm:$0xff]  ;;  %v1928_v32 = vpop.f32.mrf.mxu1 }
 0x3ae   : > { %v2003_v23 = vpop.xlane.xlu0 %2002 }
 0x3af   : > { %2792 = vst.msk [vmem:[%s3983_s15 + $0x290] sm:$0xff] %vm2709_vm2, %v2663_v19  ;;  %v2664_v26 = vmax.f32 %v2536_v20, 0.0  ;;  %v2473_v30 = vadd.f32 %v2345_v18, %v2003_v23  ;;  %2119 = vmax.xlane.f32.xlu1 %v2118_v21  ;;  %v2313_v19 = vsel %vm1940_vm1, %v1925_v54, -inf  ;;  %v2355_v21 = vld [vmem:[%s4738_s6 + $0xf0] sm:$0xff]  ;;  %v2360_v54 = vld [vmem:[%s4738_s6 + $0x118] sm:$0xff] }
 0x3b0   : > { %v2006_v33 = vpop.xlane.xlu1 %2005 }
 0x3b1   : > { %2793 = vst.msk [vmem:[%s3983_s15 + $0x298] sm:$0xff] %vm2709_vm2, %v2664_v26  ;;  %v2601_v35 = vmax.f32 %v2473_v30, 0.0  ;;  %v2474_v6 = vadd.f32 %v2346_v24, %v2006_v33  ;;  %2296 = vmax.xlane.f32.xlu0 %v2295_v31  ;;  %v2316_v26 = vsel %vm1940_vm1, %v1928_v32, -inf  ;;  %v2417_v32 = vld [vmem:[%s4738_s6 + $0x2e0] sm:$0xff] }
 0x3b2   : > { %v2183_v36 = vpop.xlane.xlu0 %2182 }
 0x3b3   : > { %2730 = vst.msk [vmem:[%s3983_s15 + $0xa0] sm:$0xff] %vm2709_vm2, %v2601_v35  ;;  %v2602_v41 = vmax.f32 %v2474_v6, 0.0  ;;  %v2533_v44 = vadd.f32 %v2405_v34, %v2183_v36  ;;  %2299 = vmax.xlane.f32.xlu1 %v2298_v43  ;;  %v2319_v34 = vsel %vm1940_vm1, %v3245_v59, -inf  ;;  %v2415_v6 = vld [vmem:[%s4738_s6 + $0x2d0] sm:$0xff] }
 0x3b4   : > { %v2186_v53 = vpop.xlane.xlu1 %2185 }
 0x3b5   : > { %2731 = vst.msk [vmem:[%s3983_s15 + $0xa8] sm:$0xff] %vm2709_vm2, %v2602_v41  ;;  %v2661_v45 = vmax.f32 %v2533_v44, 0.0  ;;  %v2534_v47 = vadd.f32 %v2406_v38, %v2186_v53  ;;  %2110 = vmax.xlane.f32.xlu0 %v2109_v46  ;;  %v2322_v38 = vsel %vm1940_vm1, %v3246_v7, -inf  ;;  %v2416_v41 = vld [vmem:[%s4738_s6 + $0x2d8] sm:$0xff]  ;;  %v2353_v53 = vld [vmem:[%s4738_s6 + $0xe0] sm:$0xff] }
 0x3b6   : > { %v2021_v28 = vpop.xlane.xlu0 %2020 }
 0x3b7   : > { %2790 = vst.msk [vmem:[%s3983_s15 + $0x280] sm:$0xff] %vm2709_vm2, %v2661_v45  ;;  %v2662_v50 = vmax.f32 %v2534_v47, 0.0  ;;  %v2479_v51 = vadd.f32 %v2351_v39, %v2021_v28  ;;  %2113 = vmax.xlane.f32.xlu1 %v2112_v1  ;;  %v2354_v1 = vld [vmem:[%s4738_s6 + $0xe8] sm:$0xff] }
 0x3b8   : > { %v2024_v52 = vpop.xlane.xlu1 %2023 }
 0x3b9   : > { %2791 = vst.msk [vmem:[%s3983_s15 + $0x288] sm:$0xff] %vm2709_vm2, %v2662_v50  ;;  %v2607_v57 = vmax.f32 %v2479_v51, 0.0  ;;  %v2480_v48 = vadd.f32 %v2352_v49, %v2024_v52  ;;  %2290 = vmax.xlane.f32.xlu0 %v2289_v27  ;;  %v2413_v51 = vld [vmem:[%s4738_s6 + $0x2c0] sm:$0xff] }
 0x3ba   : > { %v2201_v42 = vpop.xlane.xlu0 %2200 }
 0x3bb   : > { %2736 = vst.msk [vmem:[%s3983_s15 + $0xd0] sm:$0xff] %vm2709_vm2, %v2607_v57  ;;  %v2608_v40 = vmax.f32 %v2480_v48, 0.0  ;;  %v2539_v60 = vadd.f32 %v2411_v22, %v2201_v42  ;;  %2293 = vmax.xlane.f32.xlu1 %v2292_v55  ;;  %v2414_v22 = vld [vmem:[%s4738_s6 + $0x2c8] sm:$0xff]  ;;  %v2359_v42 = vld [vmem:[%s4738_s6 + $0x110] sm:$0xff] }
 0x3bc   : > { %v2204_v62 = vpop.xlane.xlu1 %2203 }
 0x3bd   : > { %2737 = vst.msk [vmem:[%s3983_s15 + $0xd8] sm:$0xff] %vm2709_vm2, %v2608_v40  ;;  %v2667_v63 = vmax.f32 %v2539_v60, 0.0  ;;  %v2540_v0 = vadd.f32 %v2412_v29, %v2204_v62  ;;  %2308 = vmax.xlane.f32.xlu0 %v2307_v61 }
 0x3be   : > { %v2015_v4 = vpop.xlane.xlu0 %2014 }
 0x3bf   : > { %2796 = vst.msk [vmem:[%s3983_s15 + $0x2b0] sm:$0xff] %vm2709_vm2, %v2667_v63  ;;  %v2668_v2 = vmax.f32 %v2540_v0, 0.0  ;;  %v2477_v9 = vadd.f32 %v2349_v56, %v2015_v4  ;;  %2311 = vmax.xlane.f32.xlu1 %v2310_v3  ;;  %v2419_v63 = vld [vmem:[%s4738_s6 + $0x2f0] sm:$0xff] }
 0x3c0   : > { %v2018_v11 = vpop.xlane.xlu1 %2017 }
 0x3c1   : > { %2797 = vst.msk [vmem:[%s3983_s15 + $0x2b8] sm:$0xff] %vm2709_vm2, %v2668_v2  ;;  %v2605_v58 = vmax.f32 %v2477_v9, 0.0  ;;  %v2478_v13 = vadd.f32 %v2350_v5, %v2018_v11  ;;  %2302 = vmax.xlane.f32.xlu0 %v2301_v10  ;;  %v2420_v5 = vld [vmem:[%s4738_s6 + $0x2f8] sm:$0xff]  ;;  %v2357_v10 = vld [vmem:[%s4738_s6 + $0x100] sm:$0xff] }
 0x3c2   : > { %v2195_v16 = vpop.xlane.xlu0 %2194 }
 0x3c3   : > { %2734 = vst.msk [vmem:[%s3983_s15 + $0xc0] sm:$0xff] %vm2709_vm2, %v2605_v58  ;;  %v2606_v18 = vmax.f32 %v2478_v13, 0.0  ;;  %v2537_v8 = vadd.f32 %v2409_v12, %v2195_v16  ;;  %2305 = vmax.xlane.f32.xlu1 %v2304_v14  ;;  %v2358_v13 = vld [vmem:[%s4738_s6 + $0x108] sm:$0xff] }
 0x3c4   : > { %v2198_v20 = vpop.xlane.xlu1 %2197 }
 0x3c5   : > { %2735 = vst.msk [vmem:[%s3983_s15 + $0xc8] sm:$0xff] %vm2709_vm2, %v2606_v18  ;;  %v2665_v23 = vmax.f32 %v2537_v8, 0.0  ;;  %v2538_v24 = vadd.f32 %v2410_v17, %v2198_v20  ;;  %2314 = vmax.xlane.f32.xlu0 %v2313_v19  ;;  %v2418_v20 = vld [vmem:[%s4738_s6 + $0x2e8] sm:$0xff] }
 0x3c6   : > { %v2033_v30 = vpop.xlane.xlu0 %2032 }
 0x3c7   : > { %2794 = vst.msk [vmem:[%s3983_s15 + $0x2a0] sm:$0xff] %vm2709_vm2, %v2665_v23  ;;  %v2666_v31 = vmax.f32 %v2538_v24, 0.0  ;;  %v2483_v33 = vadd.f32 %v2355_v21, %v2033_v30  ;;  %2317 = vmax.xlane.f32.xlu1 %v2316_v26  ;;  %v2363_v26 = vld [vmem:[%s4738_s6 + $0x130] sm:$0xff] }
 0x3c8   : > { %v2036_v35 = vpop.xlane.xlu1 %2035 }
 0x3c9   : > { %2795 = vst.msk [vmem:[%s3983_s15 + $0x2a8] sm:$0xff] %vm2709_vm2, %v2666_v31  ;;  %v2611_v43 = vmax.f32 %v2483_v33, 0.0  ;;  %v2484_v36 = vadd.f32 %v2356_v15, %v2036_v35  ;;  %2320 = vmax.xlane.f32.xlu0 %v2319_v34  ;;  %v2364_v33 = vld [vmem:[%s4738_s6 + $0x138] sm:$0xff] }
 0x3ca   : > { %v2213_v25 = vpop.xlane.xlu0 %2212 }
 0x3cb   : > { %2740 = vst.msk [vmem:[%s3983_s15 + $0xf0] sm:$0xff] %vm2709_vm2, %v2611_v43  ;;  %v2612_v44 = vmax.f32 %v2484_v36, 0.0  ;;  %v2543_v37 = vadd.f32 %v2415_v6, %v2213_v25  ;;  %2323 = vmax.xlane.f32.xlu1 %v2322_v38  ;;  %v2423_v43 = vld [vmem:[%s4738_s6 + $0x310] sm:$0xff] }
 0x3cc   : > { %v2216_v46 = vpop.xlane.xlu1 %2215 }
 0x3cd   : > { %2741 = vst.msk [vmem:[%s3983_s15 + $0xf8] sm:$0xff] %vm2709_vm2, %v2612_v44  ;;  %v2671_v39 = vmax.f32 %v2543_v37, 0.0  ;;  %v2544_v45 = vadd.f32 %v2416_v41, %v2216_v46  ;;  %v2424_v41 = vld [vmem:[%s4738_s6 + $0x318] sm:$0xff] }
 0x3ce   : > { %v2027_v47 = vpop.xlane.xlu0 %2026 }
 0x3cf   : > { %2800 = vst.msk [vmem:[%s3983_s15 + $0x2d0] sm:$0xff] %vm2709_vm2, %v2671_v39  ;;  %v2672_v28 = vmax.f32 %v2544_v45, 0.0  ;;  %v2481_v49 = vadd.f32 %v2353_v53, %v2027_v47  ;;  %v2361_v53 = vld [vmem:[%s4738_s6 + $0x120] sm:$0xff] }
 0x3d0   : > { %v2030_v50 = vpop.xlane.xlu1 %2029 }
 0x3d1   : > { %2801 = vst.msk [vmem:[%s3983_s15 + $0x2d8] sm:$0xff] %vm2709_vm2, %v2672_v28  ;;  %v2609_v59 = vmax.f32 %v2481_v49, 0.0  ;;  %v2482_v27 = vadd.f32 %v2354_v1, %v2030_v50  ;;  %v2362_v1 = vld [vmem:[%s4738_s6 + $0x128] sm:$0xff] }
 0x3d2   : > { %v2207_v52 = vpop.xlane.xlu0 %2206 }
 0x3d3   : > { %2738 = vst.msk [vmem:[%s3983_s15 + $0xe0] sm:$0xff] %vm2709_vm2, %v2609_v59  ;;  %v2610_v57 = vmax.f32 %v2482_v27, 0.0  ;;  %v2541_v48 = vadd.f32 %v2413_v51, %v2207_v52  ;;  %v2421_v51 = vld [vmem:[%s4738_s6 + $0x300] sm:$0xff] }
 0x3d4   : > { %v2210_v55 = vpop.xlane.xlu1 %2209 }
 0x3d5   : > { %2739 = vst.msk [vmem:[%s3983_s15 + $0xe8] sm:$0xff] %vm2709_vm2, %v2610_v57  ;;  %v2669_v29 = vmax.f32 %v2541_v48, 0.0  ;;  %v2542_v40 = vadd.f32 %v2414_v22, %v2210_v55  ;;  %v2422_v22 = vld [vmem:[%s4738_s6 + $0x308] sm:$0xff] }
 0x3d6   : > { %v2045_v60 = vpop.xlane.xlu0 %2044 }
 0x3d7   : > { %2798 = vst.msk [vmem:[%s3983_s15 + $0x2c0] sm:$0xff] %vm2709_vm2, %v2669_v29  ;;  %v2670_v61 = vmax.f32 %v2542_v40, 0.0  ;;  %v2487_v62 = vadd.f32 %v2359_v42, %v2045_v60  ;;  %v2367_v42 = vld [vmem:[%s4738_s6 + $0x150] sm:$0xff] }
 0x3d8   : > { %v2048_v56 = vpop.xlane.xlu1 %2047 }
 0x3d9   : > { %2799 = vst.msk [vmem:[%s3983_s15 + $0x2c8] sm:$0xff] %vm2709_vm2, %v2670_v61  ;;  %v2615_v0 = vmax.f32 %v2487_v62, 0.0  ;;  %v2488_v3 = vadd.f32 %v2360_v54, %v2048_v56  ;;  %v2368_v54 = vld [vmem:[%s4738_s6 + $0x158] sm:$0xff] }
 0x3da   : > { %v2225_v4 = vpop.xlane.xlu0 %2224 }
 0x3db   : > { %2744 = vst.msk [vmem:[%s3983_s15 + $0x110] sm:$0xff] %vm2709_vm2, %v2615_v0  ;;  %v2616_v2 = vmax.f32 %v2488_v3, 0.0  ;;  %v2547_v7 = vadd.f32 %v2419_v63, %v2225_v4  ;;  %v2427_v63 = vld [vmem:[%s4738_s6 + $0x330] sm:$0xff] }
 0x3dc   : > { %v2228_v9 = vpop.xlane.xlu1 %2227 }
 0x3dd   : > { %2745 = vst.msk [vmem:[%s3983_s15 + $0x118] sm:$0xff] %vm2709_vm2, %v2616_v2  ;;  %v2675_v11 = vmax.f32 %v2547_v7, 0.0  ;;  %v2548_v12 = vadd.f32 %v2420_v5, %v2228_v9  ;;  %v2428_v5 = vld [vmem:[%s4738_s6 + $0x338] sm:$0xff] }
 0x3de   : > { %v2039_v58 = vpop.xlane.xlu0 %2038 }
 0x3df   : > { %2804 = vst.msk [vmem:[%s3983_s15 + $0x2f0] sm:$0xff] %vm2709_vm2, %v2675_v11  ;;  %v2676_v14 = vmax.f32 %v2548_v12, 0.0  ;;  %v2485_v16 = vadd.f32 %v2357_v10, %v2039_v58  ;;  %v2365_v10 = vld [vmem:[%s4738_s6 + $0x140] sm:$0xff] }
 0x3e0   : > { %v2042_v17 = vpop.xlane.xlu1 %2041 }
 0x3e1   : > { %2805 = vst.msk [vmem:[%s3983_s15 + $0x2f8] sm:$0xff] %vm2709_vm2, %v2676_v14  ;;  %v2613_v18 = vmax.f32 %v2485_v16, 0.0  ;;  %v2486_v8 = vadd.f32 %v2358_v13, %v2042_v17  ;;  %v2366_v13 = vld [vmem:[%s4738_s6 + $0x148] sm:$0xff] }
 0x3e2   : > { %v2219_v19 = vpop.xlane.xlu0 %2218 }
 0x3e3   : > { %2742 = vst.msk [vmem:[%s3983_s15 + $0x100] sm:$0xff] %vm2709_vm2, %v2613_v18  ;;  %v2614_v21 = vmax.f32 %v2486_v8, 0.0  ;;  %v2545_v23 = vadd.f32 %v2417_v32, %v2219_v19  ;;  %v2425_v32 = vld [vmem:[%s4738_s6 + $0x320] sm:$0xff] }
 0x3e4   : > { %v2222_v24 = vpop.xlane.xlu1 %2221 }
 0x3e5   : > { %2743 = vst.msk [vmem:[%s3983_s15 + $0x108] sm:$0xff] %vm2709_vm2, %v2614_v21  ;;  %v2673_v30 = vmax.f32 %v2545_v23, 0.0  ;;  %v2546_v15 = vadd.f32 %v2418_v20, %v2222_v24  ;;  %v2426_v20 = vld [vmem:[%s4738_s6 + $0x328] sm:$0xff] }
 0x3e6   : > { %v2057_v31 = vpop.xlane.xlu0 %2056 }
 0x3e7   : > { %2802 = vst.msk [vmem:[%s3983_s15 + $0x2e0] sm:$0xff] %vm2709_vm2, %v2673_v30  ;;  %v2674_v34 = vmax.f32 %v2546_v15, 0.0  ;;  %v2491_v35 = vadd.f32 %v2363_v26, %v2057_v31  ;;  %v2371_v26 = vld [vmem:[%s4738_s6 + $0x170] sm:$0xff] }
 0x3e8   : > { %v2060_v6 = vpop.xlane.xlu1 %2059 }
 0x3e9   : > { %2803 = vst.msk [vmem:[%s3983_s15 + $0x2e8] sm:$0xff] %vm2709_vm2, %v2674_v34  ;;  %v2619_v36 = vmax.f32 %v2491_v35, 0.0  ;;  %v2492_v38 = vadd.f32 %v2364_v33, %v2060_v6  ;;  %v2372_v33 = vld [vmem:[%s4738_s6 + $0x178] sm:$0xff] }
 0x3ea   : > { %v2237_v25 = vpop.xlane.xlu0 %2236 }
 0x3eb   : > { %2748 = vst.msk [vmem:[%s3983_s15 + $0x130] sm:$0xff] %vm2709_vm2, %v2619_v36  ;;  %v2620_v44 = vmax.f32 %v2492_v38, 0.0  ;;  %v2551_v37 = vadd.f32 %v2423_v43, %v2237_v25  ;;  %v2431_v43 = vld [vmem:[%s4738_s6 + $0x350] sm:$0xff] }
 0x3ec   : > { %v2240_v46 = vpop.xlane.xlu1 %2239 }
 0x3ed   : > { %2749 = vst.msk [vmem:[%s3983_s15 + $0x138] sm:$0xff] %vm2709_vm2, %v2620_v44  ;;  %v2679_v39 = vmax.f32 %v2551_v37, 0.0  ;;  %v2552_v45 = vadd.f32 %v2424_v41, %v2240_v46  ;;  %v2432_v41 = vld [vmem:[%s4738_s6 + $0x358] sm:$0xff] }
 0x3ee   : > { %v2051_v47 = vpop.xlane.xlu0 %2050 }
 0x3ef   : > { %2808 = vst.msk [vmem:[%s3983_s15 + $0x310] sm:$0xff] %vm2709_vm2, %v2679_v39  ;;  %v2680_v28 = vmax.f32 %v2552_v45, 0.0  ;;  %v2489_v49 = vadd.f32 %v2361_v53, %v2051_v47  ;;  %v2369_v53 = vld [vmem:[%s4738_s6 + $0x160] sm:$0xff] }
 0x3f0   : > { %v2054_v50 = vpop.xlane.xlu1 %2053 }
 0x3f1   : > { %2809 = vst.msk [vmem:[%s3983_s15 + $0x318] sm:$0xff] %vm2709_vm2, %v2680_v28  ;;  %v2617_v59 = vmax.f32 %v2489_v49, 0.0  ;;  %v2490_v27 = vadd.f32 %v2362_v1, %v2054_v50  ;;  %v2370_v1 = vld [vmem:[%s4738_s6 + $0x168] sm:$0xff] }
 0x3f2   : > { %v2231_v52 = vpop.xlane.xlu0 %2230 }
 0x3f3   : > { %2746 = vst.msk [vmem:[%s3983_s15 + $0x120] sm:$0xff] %vm2709_vm2, %v2617_v59  ;;  %v2618_v57 = vmax.f32 %v2490_v27, 0.0  ;;  %v2549_v48 = vadd.f32 %v2421_v51, %v2231_v52  ;;  %v2429_v51 = vld [vmem:[%s4738_s6 + $0x340] sm:$0xff] }
 0x3f4   : > { %v2234_v55 = vpop.xlane.xlu1 %2233 }
 0x3f5   : > { %2747 = vst.msk [vmem:[%s3983_s15 + $0x128] sm:$0xff] %vm2709_vm2, %v2618_v57  ;;  %v2677_v29 = vmax.f32 %v2549_v48, 0.0  ;;  %v2550_v40 = vadd.f32 %v2422_v22, %v2234_v55  ;;  %v2430_v22 = vld [vmem:[%s4738_s6 + $0x348] sm:$0xff] }
 0x3f6   : > { %v2069_v60 = vpop.xlane.xlu0 %2068 }
 0x3f7   : > { %2806 = vst.msk [vmem:[%s3983_s15 + $0x300] sm:$0xff] %vm2709_vm2, %v2677_v29  ;;  %v2678_v61 = vmax.f32 %v2550_v40, 0.0  ;;  %v2495_v62 = vadd.f32 %v2367_v42, %v2069_v60  ;;  %v2375_v42 = vld [vmem:[%s4738_s6 + $0x190] sm:$0xff] }
 0x3f8   : > { %v2072_v56 = vpop.xlane.xlu1 %2071 }
 0x3f9   : > { %2807 = vst.msk [vmem:[%s3983_s15 + $0x308] sm:$0xff] %vm2709_vm2, %v2678_v61  ;;  %v2623_v0 = vmax.f32 %v2495_v62, 0.0  ;;  %v2496_v3 = vadd.f32 %v2368_v54, %v2072_v56  ;;  %v2376_v54 = vld [vmem:[%s4738_s6 + $0x198] sm:$0xff] }
 0x3fa   : > { %v2249_v4 = vpop.xlane.xlu0 %2248 }
 0x3fb   : > { %2752 = vst.msk [vmem:[%s3983_s15 + $0x150] sm:$0xff] %vm2709_vm2, %v2623_v0  ;;  %v2624_v2 = vmax.f32 %v2496_v3, 0.0  ;;  %v2555_v7 = vadd.f32 %v2427_v63, %v2249_v4  ;;  %v2435_v63 = vld [vmem:[%s4738_s6 + $0x370] sm:$0xff] }
 0x3fc   : > { %v2252_v9 = vpop.xlane.xlu1 %2251 }
 0x3fd   : > { %2753 = vst.msk [vmem:[%s3983_s15 + $0x158] sm:$0xff] %vm2709_vm2, %v2624_v2  ;;  %v2683_v11 = vmax.f32 %v2555_v7, 0.0  ;;  %v2556_v12 = vadd.f32 %v2428_v5, %v2252_v9  ;;  %v2436_v5 = vld [vmem:[%s4738_s6 + $0x378] sm:$0xff] }
 0x3fe   : > { %v2063_v58 = vpop.xlane.xlu0 %2062 }
 0x3ff   : > { %2812 = vst.msk [vmem:[%s3983_s15 + $0x330] sm:$0xff] %vm2709_vm2, %v2683_v11  ;;  %v2684_v14 = vmax.f32 %v2556_v12, 0.0  ;;  %v2493_v16 = vadd.f32 %v2365_v10, %v2063_v58  ;;  %v2373_v10 = vld [vmem:[%s4738_s6 + $0x180] sm:$0xff] }
 0x400   : > { %v2066_v17 = vpop.xlane.xlu1 %2065 }
 0x401   : > { %2813 = vst.msk [vmem:[%s3983_s15 + $0x338] sm:$0xff] %vm2709_vm2, %v2684_v14  ;;  %v2621_v18 = vmax.f32 %v2493_v16, 0.0  ;;  %v2494_v8 = vadd.f32 %v2366_v13, %v2066_v17  ;;  %v2374_v13 = vld [vmem:[%s4738_s6 + $0x188] sm:$0xff] }
 0x402   : > { %v2243_v19 = vpop.xlane.xlu0 %2242 }
 0x403   : > { %2750 = vst.msk [vmem:[%s3983_s15 + $0x140] sm:$0xff] %vm2709_vm2, %v2621_v18  ;;  %v2622_v21 = vmax.f32 %v2494_v8, 0.0  ;;  %v2553_v23 = vadd.f32 %v2425_v32, %v2243_v19  ;;  %v2433_v32 = vld [vmem:[%s4738_s6 + $0x360] sm:$0xff] }
 0x404   : > { %v2246_v24 = vpop.xlane.xlu1 %2245 }
 0x405   : > { %2751 = vst.msk [vmem:[%s3983_s15 + $0x148] sm:$0xff] %vm2709_vm2, %v2622_v21  ;;  %v2681_v30 = vmax.f32 %v2553_v23, 0.0  ;;  %v2554_v15 = vadd.f32 %v2426_v20, %v2246_v24  ;;  %v2434_v20 = vld [vmem:[%s4738_s6 + $0x368] sm:$0xff] }
 0x406   : > { %v2081_v31 = vpop.xlane.xlu0 %2080 }
 0x407   : > { %2810 = vst.msk [vmem:[%s3983_s15 + $0x320] sm:$0xff] %vm2709_vm2, %v2681_v30  ;;  %v2682_v34 = vmax.f32 %v2554_v15, 0.0  ;;  %v2499_v35 = vadd.f32 %v2371_v26, %v2081_v31  ;;  %v2379_v26 = vld [vmem:[%s4738_s6 + $0x1b0] sm:$0xff] }
 0x408   : > { %v2084_v6 = vpop.xlane.xlu1 %2083 }
 0x409   : > { %2811 = vst.msk [vmem:[%s3983_s15 + $0x328] sm:$0xff] %vm2709_vm2, %v2682_v34  ;;  %v2627_v36 = vmax.f32 %v2499_v35, 0.0  ;;  %v2500_v38 = vadd.f32 %v2372_v33, %v2084_v6  ;;  %v2380_v33 = vld [vmem:[%s4738_s6 + $0x1b8] sm:$0xff] }
 0x40a   : > { %v2261_v25 = vpop.xlane.xlu0 %2260 }
 0x40b   : > { %2756 = vst.msk [vmem:[%s3983_s15 + $0x170] sm:$0xff] %vm2709_vm2, %v2627_v36  ;;  %v2628_v44 = vmax.f32 %v2500_v38, 0.0  ;;  %v2559_v37 = vadd.f32 %v2431_v43, %v2261_v25  ;;  %v2439_v43 = vld [vmem:[%s4738_s6 + $0x390] sm:$0xff] }
 0x40c   : > { %v2264_v46 = vpop.xlane.xlu1 %2263 }
 0x40d   : > { %2757 = vst.msk [vmem:[%s3983_s15 + $0x178] sm:$0xff] %vm2709_vm2, %v2628_v44  ;;  %v2687_v39 = vmax.f32 %v2559_v37, 0.0  ;;  %v2560_v45 = vadd.f32 %v2432_v41, %v2264_v46  ;;  %v2440_v41 = vld [vmem:[%s4738_s6 + $0x398] sm:$0xff] }
 0x40e   : > { %v2075_v47 = vpop.xlane.xlu0 %2074 }
 0x40f   : > { %2816 = vst.msk [vmem:[%s3983_s15 + $0x350] sm:$0xff] %vm2709_vm2, %v2687_v39  ;;  %v2688_v28 = vmax.f32 %v2560_v45, 0.0  ;;  %v2497_v49 = vadd.f32 %v2369_v53, %v2075_v47  ;;  %v2377_v53 = vld [vmem:[%s4738_s6 + $0x1a0] sm:$0xff] }
 0x410   : > { %v2078_v50 = vpop.xlane.xlu1 %2077 }
 0x411   : > { %2817 = vst.msk [vmem:[%s3983_s15 + $0x358] sm:$0xff] %vm2709_vm2, %v2688_v28  ;;  %v2625_v59 = vmax.f32 %v2497_v49, 0.0  ;;  %v2498_v27 = vadd.f32 %v2370_v1, %v2078_v50  ;;  %v2378_v1 = vld [vmem:[%s4738_s6 + $0x1a8] sm:$0xff] }
 0x412   : > { %v2255_v52 = vpop.xlane.xlu0 %2254 }
 0x413   : > { %2754 = vst.msk [vmem:[%s3983_s15 + $0x160] sm:$0xff] %vm2709_vm2, %v2625_v59  ;;  %v2626_v57 = vmax.f32 %v2498_v27, 0.0  ;;  %v2557_v48 = vadd.f32 %v2429_v51, %v2255_v52  ;;  %v2437_v51 = vld [vmem:[%s4738_s6 + $0x380] sm:$0xff] }
 0x414   : > { %v2258_v55 = vpop.xlane.xlu1 %2257 }
 0x415   : > { %2755 = vst.msk [vmem:[%s3983_s15 + $0x168] sm:$0xff] %vm2709_vm2, %v2626_v57  ;;  %v2685_v29 = vmax.f32 %v2557_v48, 0.0  ;;  %v2558_v40 = vadd.f32 %v2430_v22, %v2258_v55  ;;  %v2438_v22 = vld [vmem:[%s4738_s6 + $0x388] sm:$0xff] }
 0x416   : > { %v2093_v60 = vpop.xlane.xlu0 %2092 }
 0x417   : > { %2814 = vst.msk [vmem:[%s3983_s15 + $0x340] sm:$0xff] %vm2709_vm2, %v2685_v29  ;;  %v2686_v61 = vmax.f32 %v2558_v40, 0.0  ;;  %v2503_v62 = vadd.f32 %v2375_v42, %v2093_v60  ;;  %v2383_v42 = vld [vmem:[%s4738_s6 + $0x1d0] sm:$0xff] }
 0x418   : > { %v2096_v56 = vpop.xlane.xlu1 %2095 }
 0x419   : > { %2815 = vst.msk [vmem:[%s3983_s15 + $0x348] sm:$0xff] %vm2709_vm2, %v2686_v61  ;;  %v2631_v0 = vmax.f32 %v2503_v62, 0.0  ;;  %v2504_v3 = vadd.f32 %v2376_v54, %v2096_v56  ;;  %v2384_v54 = vld [vmem:[%s4738_s6 + $0x1d8] sm:$0xff] }
 0x41a   : > { %v2273_v4 = vpop.xlane.xlu0 %2272 }
 0x41b   : > { %2760 = vst.msk [vmem:[%s3983_s15 + $0x190] sm:$0xff] %vm2709_vm2, %v2631_v0  ;;  %v2632_v2 = vmax.f32 %v2504_v3, 0.0  ;;  %v2563_v7 = vadd.f32 %v2435_v63, %v2273_v4  ;;  %v2443_v63 = vld [vmem:[%s4738_s6 + $0x3b0] sm:$0xff] }
 0x41c   : > { %v2276_v9 = vpop.xlane.xlu1 %2275 }
 0x41d   : > { %2761 = vst.msk [vmem:[%s3983_s15 + $0x198] sm:$0xff] %vm2709_vm2, %v2632_v2  ;;  %v2691_v11 = vmax.f32 %v2563_v7, 0.0  ;;  %v2564_v12 = vadd.f32 %v2436_v5, %v2276_v9  ;;  %v2444_v5 = vld [vmem:[%s4738_s6 + $0x3b8] sm:$0xff] }
 0x41e   : > { %v2087_v58 = vpop.xlane.xlu0 %2086 }
 0x41f   : > { %2820 = vst.msk [vmem:[%s3983_s15 + $0x370] sm:$0xff] %vm2709_vm2, %v2691_v11  ;;  %v2692_v14 = vmax.f32 %v2564_v12, 0.0  ;;  %v2501_v16 = vadd.f32 %v2373_v10, %v2087_v58  ;;  %v2381_v10 = vld [vmem:[%s4738_s6 + $0x1c0] sm:$0xff] }
 0x420   : > { %v2090_v17 = vpop.xlane.xlu1 %2089 }
 0x421   : > { %2821 = vst.msk [vmem:[%s3983_s15 + $0x378] sm:$0xff] %vm2709_vm2, %v2692_v14  ;;  %v2629_v18 = vmax.f32 %v2501_v16, 0.0  ;;  %v2502_v8 = vadd.f32 %v2374_v13, %v2090_v17  ;;  %v2382_v13 = vld [vmem:[%s4738_s6 + $0x1c8] sm:$0xff] }
 0x422   : > { %v2267_v19 = vpop.xlane.xlu0 %2266 }
 0x423   : > { %2758 = vst.msk [vmem:[%s3983_s15 + $0x180] sm:$0xff] %vm2709_vm2, %v2629_v18  ;;  %v2630_v21 = vmax.f32 %v2502_v8, 0.0  ;;  %v2561_v23 = vadd.f32 %v2433_v32, %v2267_v19  ;;  %v2441_v32 = vld [vmem:[%s4738_s6 + $0x3a0] sm:$0xff] }
 0x424   : > { %v2270_v24 = vpop.xlane.xlu1 %2269 }
 0x425   : > { %2759 = vst.msk [vmem:[%s3983_s15 + $0x188] sm:$0xff] %vm2709_vm2, %v2630_v21  ;;  %v2689_v30 = vmax.f32 %v2561_v23, 0.0  ;;  %v2562_v15 = vadd.f32 %v2434_v20, %v2270_v24  ;;  %v2442_v20 = vld [vmem:[%s4738_s6 + $0x3a8] sm:$0xff] }
 0x426   : > { %v2105_v31 = vpop.xlane.xlu0 %2104 }
 0x427   : > { %2818 = vst.msk [vmem:[%s3983_s15 + $0x360] sm:$0xff] %vm2709_vm2, %v2689_v30  ;;  %v2690_v34 = vmax.f32 %v2562_v15, 0.0  ;;  %v2507_v35 = vadd.f32 %v2379_v26, %v2105_v31  ;;  %v2447_v26 = vld [vmem:[%s4738_s6 + $0x3d0] sm:$0xff] }
 0x428   : > { %v2108_v6 = vpop.xlane.xlu1 %2107 }
 0x429   : > { %2819 = vst.msk [vmem:[%s3983_s15 + $0x368] sm:$0xff] %vm2709_vm2, %v2690_v34  ;;  %v2635_v36 = vmax.f32 %v2507_v35, 0.0  ;;  %v2508_v38 = vadd.f32 %v2380_v33, %v2108_v6  ;;  %v2448_v33 = vld [vmem:[%s4738_s6 + $0x3d8] sm:$0xff] }
 0x42a   : > { %v2285_v25 = vpop.xlane.xlu0 %2284 }
 0x42b   : > { %2764 = vst.msk [vmem:[%s3983_s15 + $0x1b0] sm:$0xff] %vm2709_vm2, %v2635_v36  ;;  %v2636_v44 = vmax.f32 %v2508_v38, 0.0  ;;  %v2567_v37 = vadd.f32 %v2439_v43, %v2285_v25  ;;  %v2445_v43 = vld [vmem:[%s4738_s6 + $0x3c0] sm:$0xff] }
 0x42c   : > { %v2288_v46 = vpop.xlane.xlu1 %2287 }
 0x42d   : > { %2765 = vst.msk [vmem:[%s3983_s15 + $0x1b8] sm:$0xff] %vm2709_vm2, %v2636_v44  ;;  %v2695_v39 = vmax.f32 %v2567_v37, 0.0  ;;  %v2568_v45 = vadd.f32 %v2440_v41, %v2288_v46  ;;  %v2446_v41 = vld [vmem:[%s4738_s6 + $0x3c8] sm:$0xff] }
 0x42e   : > { %v2099_v47 = vpop.xlane.xlu0 %2098 }
 0x42f   : > { %2824 = vst.msk [vmem:[%s3983_s15 + $0x390] sm:$0xff] %vm2709_vm2, %v2695_v39  ;;  %v2696_v28 = vmax.f32 %v2568_v45, 0.0  ;;  %v2505_v49 = vadd.f32 %v2377_v53, %v2099_v47  ;;  %v2449_v53 = vld [vmem:[%s4738_s6 + $0x3e0] sm:$0xff] }
 0x430   : > { %v2102_v50 = vpop.xlane.xlu1 %2101 }
 0x431   : > { %2825 = vst.msk [vmem:[%s3983_s15 + $0x398] sm:$0xff] %vm2709_vm2, %v2696_v28  ;;  %v2633_v59 = vmax.f32 %v2505_v49, 0.0  ;;  %v2506_v27 = vadd.f32 %v2378_v1, %v2102_v50  ;;  %v2450_v1 = vld [vmem:[%s4738_s6 + $0x3e8] sm:$0xff] }
 0x432   : > { %v2279_v52 = vpop.xlane.xlu0 %2278 }
 0x433   : > { %2762 = vst.msk [vmem:[%s3983_s15 + $0x1a0] sm:$0xff] %vm2709_vm2, %v2633_v59  ;;  %v2634_v57 = vmax.f32 %v2506_v27, 0.0  ;;  %v2565_v48 = vadd.f32 %v2437_v51, %v2279_v52  ;;  %v2451_v51 = vld [vmem:[%s4738_s6 + $0x3f0] sm:$0xff] }
 0x434   : > { %v2282_v55 = vpop.xlane.xlu1 %2281 }
 0x435   : > { %2763 = vst.msk [vmem:[%s3983_s15 + $0x1a8] sm:$0xff] %vm2709_vm2, %v2634_v57  ;;  %v2693_v29 = vmax.f32 %v2565_v48, 0.0  ;;  %v2566_v40 = vadd.f32 %v2438_v22, %v2282_v55  ;;  %v2452_v22 = vld [vmem:[%s4738_s6 + $0x3f8] sm:$0xff] }
 0x436   : > { %v2117_v60 = vpop.xlane.xlu0 %2116 }
 0x437   : > { %2822 = vst.msk [vmem:[%s3983_s15 + $0x380] sm:$0xff] %vm2709_vm2, %v2693_v29  ;;  %v2694_v61 = vmax.f32 %v2566_v40, 0.0  ;;  %v2511_v62 = vadd.f32 %v2383_v42, %v2117_v60 }
 0x438   : > { %v2120_v56 = vpop.xlane.xlu1 %2119 }
 0x439   : > { %2823 = vst.msk [vmem:[%s3983_s15 + $0x388] sm:$0xff] %vm2709_vm2, %v2694_v61  ;;  %v2639_v0 = vmax.f32 %v2511_v62, 0.0  ;;  %v2512_v3 = vadd.f32 %v2384_v54, %v2120_v56 }
 0x43a   : > { %v2297_v4 = vpop.xlane.xlu0 %2296 }
 0x43b   : > { %2768 = vst.msk [vmem:[%s3983_s15 + $0x1d0] sm:$0xff] %vm2709_vm2, %v2639_v0  ;;  %v2640_v2 = vmax.f32 %v2512_v3, 0.0  ;;  %v2571_v7 = vadd.f32 %v2443_v63, %v2297_v4 }
 0x43c   : > { %v2300_v9 = vpop.xlane.xlu1 %2299 }
 0x43d   : > { %2769 = vst.msk [vmem:[%s3983_s15 + $0x1d8] sm:$0xff] %vm2709_vm2, %v2640_v2  ;;  %v2699_v11 = vmax.f32 %v2571_v7, 0.0  ;;  %v2572_v12 = vadd.f32 %v2444_v5, %v2300_v9 }
 0x43e   : > { %v2111_v58 = vpop.xlane.xlu0 %2110 }
 0x43f   : > { %2828 = vst.msk [vmem:[%s3983_s15 + $0x3b0] sm:$0xff] %vm2709_vm2, %v2699_v11  ;;  %v2700_v14 = vmax.f32 %v2572_v12, 0.0  ;;  %v2509_v16 = vadd.f32 %v2381_v10, %v2111_v58 }
 0x440   : > { %v2114_v17 = vpop.xlane.xlu1 %2113 }
 0x441   : > { %2829 = vst.msk [vmem:[%s3983_s15 + $0x3b8] sm:$0xff] %vm2709_vm2, %v2700_v14  ;;  %v2637_v18 = vmax.f32 %v2509_v16, 0.0  ;;  %v2510_v8 = vadd.f32 %v2382_v13, %v2114_v17 }
 0x442   : > { %v2291_v19 = vpop.xlane.xlu0 %2290 }
 0x443   : > { %2766 = vst.msk [vmem:[%s3983_s15 + $0x1c0] sm:$0xff] %vm2709_vm2, %v2637_v18  ;;  %v2638_v21 = vmax.f32 %v2510_v8, 0.0  ;;  %v2569_v23 = vadd.f32 %v2441_v32, %v2291_v19 }
 0x444   : > { %v2294_v24 = vpop.xlane.xlu1 %2293 }
 0x445   : > { %2767 = vst.msk [vmem:[%s3983_s15 + $0x1c8] sm:$0xff] %vm2709_vm2, %v2638_v21  ;;  %v2697_v30 = vmax.f32 %v2569_v23, 0.0  ;;  %v2570_v15 = vadd.f32 %v2442_v20, %v2294_v24 }
 0x446   : > { %v2309_v31 = vpop.xlane.xlu0 %2308 }
 0x447   : > { %2826 = vst.msk [vmem:[%s3983_s15 + $0x3a0] sm:$0xff] %vm2709_vm2, %v2697_v30  ;;  %v2698_v34 = vmax.f32 %v2570_v15, 0.0  ;;  %v2575_v35 = vadd.f32 %v2447_v26, %v2309_v31 }
 0x448   : > { %v2312_v6 = vpop.xlane.xlu1 %2311 }
 0x449   : > { %2827 = vst.msk [vmem:[%s3983_s15 + $0x3a8] sm:$0xff] %vm2709_vm2, %v2698_v34  ;;  %v2703_v36 = vmax.f32 %v2575_v35, 0.0  ;;  %v2576_v38 = vadd.f32 %v2448_v33, %v2312_v6 }
 0x44a   : > { %v2303_v25 = vpop.xlane.xlu0 %2302 }
 0x44b   : > { %2832 = vst.msk [vmem:[%s3983_s15 + $0x3d0] sm:$0xff] %vm2709_vm2, %v2703_v36  ;;  %v2704_v44 = vmax.f32 %v2576_v38, 0.0  ;;  %v2573_v37 = vadd.f32 %v2445_v43, %v2303_v25 }
 0x44c   : > { %v2306_v46 = vpop.xlane.xlu1 %2305 }
 0x44d   : > { %2833 = vst.msk [vmem:[%s3983_s15 + $0x3d8] sm:$0xff] %vm2709_vm2, %v2704_v44  ;;  %v2701_v39 = vmax.f32 %v2573_v37, 0.0  ;;  %v2574_v45 = vadd.f32 %v2446_v41, %v2306_v46 }
 0x44e   : > { %v2315_v47 = vpop.xlane.xlu0 %2314 }
 0x44f   : > { %2830 = vst.msk [vmem:[%s3983_s15 + $0x3c0] sm:$0xff] %vm2709_vm2, %v2701_v39  ;;  %v2702_v28 = vmax.f32 %v2574_v45, 0.0  ;;  %v2577_v49 = vadd.f32 %v2449_v53, %v2315_v47 }
 0x450   : > { %v2318_v50 = vpop.xlane.xlu1 %2317 }
 0x451   : > { %2831 = vst.msk [vmem:[%s3983_s15 + $0x3c8] sm:$0xff] %vm2709_vm2, %v2702_v28  ;;  %v2705_v59 = vmax.f32 %v2577_v49, 0.0  ;;  %v2578_v27 = vadd.f32 %v2450_v1, %v2318_v50 }
 0x452   : > { %v2321_v52 = vpop.xlane.xlu0 %2320 }
 0x453   : > { %2834 = vst.msk [vmem:[%s3983_s15 + $0x3e0] sm:$0xff] %vm2709_vm2, %v2705_v59  ;;  %v2706_v57 = vmax.f32 %v2578_v27, 0.0  ;;  %v2579_v48 = vadd.f32 %v2451_v51, %v2321_v52 }
 0x454   : > { %v2324_v55 = vpop.xlane.xlu1 %2323 }
 0x455   : > { %2835 = vst.msk [vmem:[%s3983_s15 + $0x3e8] sm:$0xff] %vm2709_vm2, %v2706_v57  ;;  %v2707_v42 = vmax.f32 %v2579_v48, 0.0  ;;  %v2580_v29 = vadd.f32 %v2452_v22, %v2324_v55 }
 0x457   : > { %2836 = vst.msk [vmem:[%s3983_s15 + $0x3f0] sm:$0xff] %vm2709_vm2, %v2707_v42  ;;  %v2708_v40 = vmax.f32 %v2580_v29, 0.0 }
 0x459   : > { %2837 = vst.msk [vmem:[%s3983_s15 + $0x3f8] sm:$0xff] %vm2709_vm2, %v2708_v40 }
 0x45a PF: > { %s17_s26 = sadd.s32 1, %s3410_s26   ;;  %s4740_s24 = smov %s3406_s25 }
 0x45b   : > { %p14_p5 = scmp.ge.s32.totalorder %s17_s26, 4   ;;  %s4741_s25 = smov %s4743_s27 }
 0x45d   :  { %16 = sbr.rel (!%p14_p5) target bundleno = 2 (0x2), region = 78 }

</bundles_post_ra>
